<compile_context>
chip_gen: v6e
topology: v6e:2x2x1
jax: 0.10.0
libtpu: 0.0.40
codegen_flags: <defaults>
</compile_context>

<pallas_src>
import jax
import jax.numpy as jnp
from jax.experimental import pallas as pl
from jax.experimental.pallas import tpu as pltpu

# ----------------------------- configuration -----------------------------
SEQ_LEN = 8
BSZ = 2
MAX_CHARS = 16

CHAR_DIM = 32
TOKEN_DIM = 32
EMBED_DIM = 32
CHAR2TOKEN_DIM = 32
FILTERS = [(2, 32), (3, 32)]                # (kernel_width, out_channels)
FINAL_DIM = sum(f[1] for f in FILTERS)
TOT_DIM = CHAR2TOKEN_DIM + TOKEN_DIM
MAX_WIDTH = max(w for w, _ in FILTERS)

CHAR_VOCAB = 40
TOKEN_VOCAB = 50
DROPOUT = 0.0                               # eval-mode / identity

# Padded sizes used by the kernel (lane / sublane friendly).
L_PAD = -(-(MAX_CHARS + MAX_WIDTH - 1) // 8) * 8          # 18 -> 24 (sublane mult)
CHAR_VOCAB_PAD = -(-CHAR_VOCAB // 128) * 128               # 40 -> 128
TOKEN_VOCAB_PAD = -(-TOKEN_VOCAB // 128) * 128             # 50 -> 128

# bf16 operands, f32 accumulation.  Set to jnp.float32 for bit-exact-vs-f32 checks.
MATMUL_DTYPE = jnp.bfloat16


# ----------------------------- tiling -----------------------------
def _choose_tiling(n):
    """Return (row_tile, n_padded).

    row_tile is a multiple of 8 and capped at 256 (v5e scoped-VMEM / v7x 64 MiB
    budget); >=2 grid steps whenever n >= 16 so both v7x TensorCores get work.
    n is padded up to a multiple of row_tile (no unbounded single-block fallback).
    """
    if n <= 8:
        return 8, 8
    half = -(-n // 2)                        # cdiv(n, 2)
    row_tile = min(256, ((half + 7) // 8) * 8)
    n_pad = ((n + row_tile - 1) // row_tile) * row_tile
    return row_tile, n_pad


# ----------------------------- fused kernel -----------------------------
def _token_encoder_kernel(cid_ref, tid_ref, ctab_ref, wtap_ref, mask_ref,
                          bconv_ref, hww_ref, hwb_ref, wochar_ref, wotok_ref,
                          bo_ref, out_ref):
    rows, l_pad = cid_ref.shape
    vp, c = ctab_ref.shape
    l_out, fd = mask_ref.shape
    tvp = wotok_ref.shape[0]
    max_w = wtap_ref.shape[0]
    dt = ctab_ref.dtype

    # --- char embedding gather as a one-hot MXU matmul (exact: one-hot select) ---
    cid = cid_ref[...]                                              # (rows, l_pad) i32
    oh = (cid[:, :, None] ==
          jax.lax.broadcasted_iota(jnp.int32, (1, 1, vp), 2)).astype(dt)
    x = jnp.dot(oh.reshape(rows * l_pad, vp), ctab_ref[...],
                preferred_element_type=jnp.float32)                 # (rows*l_pad, c)
    x = x.reshape(rows, l_pad, c).astype(dt)

    # --- all conv filters: one 2-D MXU contraction per tap (no im2col concat) ---
    acc = None
    for k in range(max_w):                                          # static unroll
        xk = x[:, k:k + l_out, :].reshape(rows * l_out, c)
        yk = jnp.dot(xk, wtap_ref[k], preferred_element_type=jnp.float32)
        acc = yk if acc is None else acc + yk
    y = acc.reshape(rows, l_out, fd) + mask_ref[...][None, :, :]    # mask invalid tails
    h = jnp.max(y, axis=1) + bconv_ref[...]                         # bias after max
    h = jnp.maximum(h, 0.0)                                         # ReLU

    # --- Highway (1 layer) ---
    hw = jnp.dot(h.astype(dt), hww_ref[...],
                 preferred_element_type=jnp.float32) + hwb_ref[...]
    new_x = jnp.maximum(hw[:, :fd], 0.0)
    gate = jax.nn.sigmoid(hw[:, fd:])
    h = new_x + gate * (h - new_x)            # == gate*h + (1-gate)*new_x

    # --- token gather folded with out_proj token block; cnn_proj folded into
    #     out_proj char block (eval-mode dropout = identity) ---
    toh = (tid_ref[...] ==
           jax.lax.broadcasted_iota(jnp.int32, (1, tvp), 1)).astype(dt)
    out = (jnp.dot(h.astype(dt), wochar_ref[...], preferred_element_type=jnp.float32)
           + jnp.dot(toh, wotok_ref[...], preferred_element_type=jnp.float32)
           + bo_ref[...])
    out_ref[...] = out.astype(out_ref.dtype)


# ----------------------------- weight folding (glue) -----------------------------
def _fold_params(params, dt):
    c = CHAR_DIM
    ctab = jnp.zeros((CHAR_VOCAB_PAD, c), jnp.float32).at[:CHAR_VOCAB].set(
        params["char_table"])
    ttab = jnp.zeros((TOKEN_VOCAB_PAD, TOKEN_DIM), jnp.float32).at[:TOKEN_VOCAB].set(
        params["token_table"])

    wtaps = jnp.zeros((MAX_WIDTH, c, FINAL_DIM), jnp.float32)
    mask = jnp.zeros((MAX_CHARS, FINAL_DIM), jnp.float32)
    bconv = jnp.zeros((1, FINAL_DIM), jnp.float32)
    col = 0
    for (width, out_c), w, b in zip(FILTERS, params["conv_ws"], params["conv_bs"]):
        for k in range(width):
            wtaps = wtaps.at[k, :, col:col + out_c].set(jnp.transpose(w[:, :, k]))
        valid = MAX_CHARS - width + 1
        mask = mask.at[valid:, col:col + out_c].set(-1e30)
        bconv = bconv.at[0, col:col + out_c].set(b)
        col += out_c

    hw_w_t = params["hw_w"].T                                   # (fd, 2*fd)
    hw_b = params["hw_b"].reshape(1, -1)

    wc = params["out_w"][:, :CHAR2TOKEN_DIM].T                  # (c2t, embed)
    wt = params["out_w"][:, CHAR2TOKEN_DIM:].T                  # (token_dim, embed)
    wo_char = params["cnn_proj_w"].T @ wc                       # (fd, embed)
    wo_tok = ttab @ wt                                          # (tok_vocab_pad, embed)
    bo = (params["cnn_proj_b"] @ wc + params["out_b"]).reshape(1, -1)

    return dict(ctab=ctab.astype(dt), wtaps=wtaps.astype(dt), mask=mask,
                bconv=bconv, hw_w=hw_w_t.astype(dt), hw_b=hw_b,
                wo_char=wo_char.astype(dt), wo_tok=wo_tok.astype(dt), bo=bo)


def _full_spec(arr):
    nd = arr.ndim
    return pl.BlockSpec(arr.shape, lambda i, _nd=nd: (0,) * _nd)


# ----------------------------- TokenEncoder forward (glue + kernel) -----------------------------
def token_encoder_forward(params, token_input, char_input):
    seq_len, bsz, max_chars = char_input.shape
    assert max_chars == MAX_CHARS
    for width, _ in FILTERS:
        assert width <= max_chars, "filter wider than max_chars would be fully masked"
    n = seq_len * bsz
    row_tile, n_pad = _choose_tiling(n)

    # Only the int32 ids go to the kernel (pads are tiny int ops).
    char_ids = jnp.pad(char_input.reshape(n, max_chars).astype(jnp.int32),
                       ((0, n_pad - n), (0, L_PAD - max_chars)), constant_values=-1)
    tok_ids = jnp.pad(token_input.reshape(n, 1).astype(jnp.int32),
                      ((0, n_pad - n), (0, 0)), constant_values=0)

    f = _fold_params(params, MATMUL_DTYPE)
    grid = (n_pad // row_tile,)

    weight_bytes = sum(int(a.size) * a.dtype.itemsize for a in f.values())
    flops = 2 * n_pad * (
        L_PAD * CHAR_VOCAB_PAD * CHAR_DIM                       # char gather matmul
        + MAX_WIDTH * MAX_CHARS * CHAR_DIM * FINAL_DIM          # conv taps
        + FINAL_DIM * 2 * FINAL_DIM                             # highway
        + FINAL_DIM * EMBED_DIM                                 # char out_proj
        + TOKEN_VOCAB_PAD * EMBED_DIM)                          # token gather+out (folded)
    cost = pl.CostEstimate(
        flops=flops,
        transcendentals=n_pad * FINAL_DIM,                      # sigmoid
        bytes_accessed=int(char_ids.size * 4 + tok_ids.size * 4
                           + n_pad * EMBED_DIM * 4 + weight_bytes))

    out = pl.pallas_call(
        _token_encoder_kernel,
        out_shape=jax.ShapeDtypeStruct((n_pad, EMBED_DIM), jnp.float32),
        grid=grid,
        in_specs=[
            # If xprof shows exposed DMA at scale: pipeline_mode=pl.Buffered(3).
            pl.BlockSpec((row_tile, L_PAD), lambda i: (i, 0)),   # char ids
            pl.BlockSpec((row_tile, 1), lambda i: (i, 0)),       # token ids
            _full_spec(f["ctab"]),
            _full_spec(f["wtaps"]),
            _full_spec(f["mask"]),
            _full_spec(f["bconv"]),
            _full_spec(f["hw_w"]),
            _full_spec(f["hw_b"]),
            _full_spec(f["wo_char"]),
            _full_spec(f["wo_tok"]),
            _full_spec(f["bo"]),
        ],
        out_specs=pl.BlockSpec((row_tile, EMBED_DIM), lambda i: (i, 0)),
        compiler_params=pltpu.CompilerParams(dimension_semantics=("parallel",)),
        cost_estimate=cost,
    )(char_ids, tok_ids, f["ctab"], f["wtaps"], f["mask"], f["bconv"],
      f["hw_w"], f["hw_b"], f["wo_char"], f["wo_tok"], f["bo"])

    return out[:n].reshape(seq_len, bsz, EMBED_DIM)


# ----------------------------- pure-JAX reference -----------------------------
def token_encoder_reference(params, token_input, char_input):
    seq_len, bsz, max_chars = char_input.shape
    n = seq_len * bsz
    char_ids = char_input.reshape(n, max_chars)
    x = jnp.take(params["char_table"], char_ids, axis=0)        # (N, L, C)

    feats = []
    for (width, out_c), w, b in zip(FILTERS, params["conv_ws"], params["conv_bs"]):
        l_out = max_chars - width + 1
        acc = jnp.zeros((n, l_out, out_c), jnp.float32)
        for k in range(width):
            acc = acc + jnp.einsum("nlc,oc->nlo", x[:, k:k + l_out, :], w[:, :, k])
        y = jnp.max(acc + b.reshape(1, 1, -1), axis=1)
        feats.append(jnp.maximum(y, 0.0))
    h = jnp.concatenate(feats, axis=-1)

    hw = h @ params["hw_w"].T + params["hw_b"]
    new_x = jnp.maximum(hw[:, :FINAL_DIM], 0.0)
    gate = jax.nn.sigmoid(hw[:, FINAL_DIM:])
    h = gate * h + (1.0 - gate) * new_x
    char_repr = h @ params["cnn_proj_w"].T + params["cnn_proj_b"]

    tok_repr = jnp.take(params["token_table"], token_input.reshape(-1), axis=0)
    cat = jnp.concatenate([char_repr, tok_repr], axis=-1)
    out = cat @ params["out_w"].T + params["out_b"]
    return out.reshape(seq_len, bsz, EMBED_DIM)


# ----------------------------- parameter init -----------------------------
def init_params(key):
    ks = jax.random.split(key, 12)
    p = {}
    char_table = 0.1 * jax.random.normal(ks[0], (CHAR_VOCAB, CHAR_DIM), jnp.float32)
    p["char_table"] = char_table.at[0].set(0.0)      # padding_idx = 0
    token_table = 0.1 * jax.random.normal(ks[1], (TOKEN_VOCAB, TOKEN_DIM), jnp.float32)
    p["token_table"] = token_table.at[0].set(0.0)

    conv_ws, conv_bs = [], []
    for i, (width, out_c) in enumerate(FILTERS):
        conv_ws.append(0.05 * jax.random.normal(ks[2 + i], (out_c, CHAR_DIM, width), jnp.float32))
        conv_bs.append(0.01 * jax.random.normal(ks[4 + i], (out_c,), jnp.float32))
    p["conv_ws"], p["conv_bs"] = conv_ws, conv_bs

    p["hw_w"] = 0.02 * jax.random.normal(ks[6], (2 * FINAL_DIM, FINAL_DIM), jnp.float32)
    p["hw_b"] = jnp.concatenate([jnp.zeros((FINAL_DIM,), jnp.float32),
                                 jnp.ones((FINAL_DIM,), jnp.float32)])
    p["cnn_proj_w"] = 0.02 * jax.random.normal(ks[7], (CHAR2TOKEN_DIM, FINAL_DIM), jnp.float32)
    p["cnn_proj_b"] = jnp.zeros((CHAR2TOKEN_DIM,), jnp.float32)

    p["out_w"] = 0.02 * jax.random.normal(ks[8], (EMBED_DIM, TOT_DIM), jnp.float32)
    p["out_b"] = jnp.zeros((EMBED_DIM,), jnp.float32)
    return p


# ----------------------------- main -----------------------------
if __name__ == "__main__":
    key = jax.random.PRNGKey(0)
    pkey, k_tok, k_chr = jax.random.split(key, 3)
    params = init_params(pkey)

    token_input = jax.random.randint(k_tok, (SEQ_LEN, BSZ), 0, TOKEN_VOCAB, dtype=jnp.int32)
    char_input = jax.random.randint(k_chr, (SEQ_LEN, BSZ, MAX_CHARS), 0, CHAR_VOCAB, dtype=jnp.int32)

    out = jax.block_until_ready(token_encoder_forward(params, token_input, char_input))
    ref = jax.block_until_ready(token_encoder_reference(params, token_input, char_input))

    assert out.shape == (SEQ_LEN, BSZ, EMBED_DIM), out.shape
    # bf16 operands (f32 accumulation) cannot match an f32 reference at 1e-4.
    if MATMUL_DTYPE == jnp.bfloat16:
        rtol, atol = 2e-2, 2e-3
    else:
        rtol, atol = 1e-4, 1e-4
    assert jnp.allclose(out, ref, rtol=rtol, atol=atol), float(jnp.max(jnp.abs(out - ref)))
    print("KERNEL_OK")
</pallas_src>

<mosaic_0001>
module attributes {stable_mosaic.version = 11 : i64} {
  func.func @_token_encoder_kernel(%arg0: i32, %arg1: memref<8x24xi32, #tpu.memory_space<vmem>>, %arg2: memref<8x1xi32, #tpu.memory_space<vmem>>, %arg3: memref<128x32xbf16, #tpu.memory_space<vmem>>, %arg4: memref<3x32x64xbf16, #tpu.memory_space<vmem>>, %arg5: memref<16x64xf32, #tpu.memory_space<vmem>>, %arg6: memref<1x64xf32, #tpu.memory_space<vmem>>, %arg7: memref<64x128xbf16, #tpu.memory_space<vmem>>, %arg8: memref<1x128xf32, #tpu.memory_space<vmem>>, %arg9: memref<64x32xbf16, #tpu.memory_space<vmem>>, %arg10: memref<128x32xbf16, #tpu.memory_space<vmem>>, %arg11: memref<1x32xf32, #tpu.memory_space<vmem>>, %arg12: memref<8x32xf32, #tpu.memory_space<vmem>>) attributes {dimension_semantics = [#tpu.dimension_semantics<parallel>], iteration_bounds = array<i64: 2>, scalar_prefetch = 0 : i64, scratch_operands = 0 : i64, tpu.core_type = #tpu.core_type<tc>, window_params = [{transform_indices = @transform_0, window_bounds = array<i64: 8, 24>}, {transform_indices = @transform_1, window_bounds = array<i64: 8, 1>}, {pipeline_mode = #tpu.pipeline_mode<synchronous>, transform_indices = @transform_2, window_bounds = array<i64: 128, 32>}, {pipeline_mode = #tpu.pipeline_mode<synchronous>, transform_indices = @transform_3, window_bounds = array<i64: 3, 32, 64>}, {pipeline_mode = #tpu.pipeline_mode<synchronous>, transform_indices = @transform_4, window_bounds = array<i64: 16, 64>}, {pipeline_mode = #tpu.pipeline_mode<synchronous>, transform_indices = @transform_5, window_bounds = array<i64: 1, 64>}, {pipeline_mode = #tpu.pipeline_mode<synchronous>, transform_indices = @transform_6, window_bounds = array<i64: 64, 128>}, {pipeline_mode = #tpu.pipeline_mode<synchronous>, transform_indices = @transform_7, window_bounds = array<i64: 1, 128>}, {pipeline_mode = #tpu.pipeline_mode<synchronous>, transform_indices = @transform_8, window_bounds = array<i64: 64, 32>}, {pipeline_mode = #tpu.pipeline_mode<synchronous>, transform_indices = @transform_9, window_bounds = array<i64: 128, 32>}, {pipeline_mode = #tpu.pipeline_mode<synchronous>, transform_indices = @transform_10, window_bounds = array<i64: 1, 32>}, {transform_indices = @transform_11, window_bounds = array<i64: 8, 32>}]} {
    %c0 = arith.constant 0 : index
    %c0_0 = arith.constant 0 : index
    %0 = vector.load %arg1[%c0, %c0_0] : memref<8x24xi32, #tpu.memory_space<vmem>>, vector<8x24xi32>
    %1 = vector.shape_cast %0 : vector<8x24xi32> to vector<8x24x1xi32>
    %2 = tpu.iota {dimensions = array<i32: 2>} : vector<1x1x128xi32>
    %3 = vector.broadcast %1 : vector<8x24x1xi32> to vector<8x24x128xi32>
    %4 = vector.broadcast %2 : vector<1x1x128xi32> to vector<8x24x128xi32>
    %5 = arith.cmpi eq, %3, %4 : vector<8x24x128xi32>
    %6 = arith.extui %5 : vector<8x24x128xi1> to vector<8x24x128xi32>
    %7 = arith.sitofp %6 : vector<8x24x128xi32> to vector<8x24x128xf32>
    %8 = arith.truncf %7 : vector<8x24x128xf32> to vector<8x24x128xbf16>
    %9 = vector.shape_cast %8 : vector<8x24x128xbf16> to vector<192x128xbf16>
    %c0_1 = arith.constant 0 : index
    %c0_2 = arith.constant 0 : index
    %10 = vector.load %arg3[%c0_1, %c0_2] : memref<128x32xbf16, #tpu.memory_space<vmem>>, vector<128x32xbf16>
    %cst = arith.constant dense<0.000000e+00> : vector<192x32xf32>
    %11 = tpu.matmul %9, %10, %cst {dimension_numbers = #tpu.dot_dimension_numbers<[1], [0], [0], [1], [0, 0, 1, 1], [], []>} : vector<192x128xbf16>, vector<128x32xbf16>, vector<192x32xf32> -> vector<192x32xf32>
    %12 = vector.shape_cast %11 : vector<192x32xf32> to vector<8x24x32xf32>
    %13 = arith.truncf %12 : vector<8x24x32xf32> to vector<8x24x32xbf16>
    %14 = vector.extract_strided_slice %13 {offsets = [0, 0, 0], sizes = [8, 16, 32], strides = [1, 1, 1]} : vector<8x24x32xbf16> to vector<8x16x32xbf16>
    %15 = vector.shape_cast %14 : vector<8x16x32xbf16> to vector<128x32xbf16>
    %c0_3 = arith.constant 0 : index
    %c0_4 = arith.constant 0 : index
    %c0_5 = arith.constant 0 : index
    %16 = vector.load %arg4[%c0_3, %c0_4, %c0_5] : memref<3x32x64xbf16, #tpu.memory_space<vmem>>, vector<1x32x64xbf16>
    %17 = vector.shape_cast %16 : vector<1x32x64xbf16> to vector<32x64xbf16>
    %cst_6 = arith.constant dense<0.000000e+00> : vector<128x64xf32>
    %18 = tpu.matmul %15, %17, %cst_6 {dimension_numbers = #tpu.dot_dimension_numbers<[1], [0], [0], [1], [0, 0, 1, 1], [], []>} : vector<128x32xbf16>, vector<32x64xbf16>, vector<128x64xf32> -> vector<128x64xf32>
    %19 = vector.extract_strided_slice %13 {offsets = [0, 1, 0], sizes = [8, 16, 32], strides = [1, 1, 1]} : vector<8x24x32xbf16> to vector<8x16x32xbf16>
    %20 = vector.shape_cast %19 : vector<8x16x32xbf16> to vector<128x32xbf16>
    %c1 = arith.constant 1 : index
    %c0_7 = arith.constant 0 : index
    %c0_8 = arith.constant 0 : index
    %21 = vector.load %arg4[%c1, %c0_7, %c0_8] : memref<3x32x64xbf16, #tpu.memory_space<vmem>>, vector<1x32x64xbf16>
    %22 = vector.shape_cast %21 : vector<1x32x64xbf16> to vector<32x64xbf16>
    %cst_9 = arith.constant dense<0.000000e+00> : vector<128x64xf32>
    %23 = tpu.matmul %20, %22, %cst_9 {dimension_numbers = #tpu.dot_dimension_numbers<[1], [0], [0], [1], [0, 0, 1, 1], [], []>} : vector<128x32xbf16>, vector<32x64xbf16>, vector<128x64xf32> -> vector<128x64xf32>
    %24 = arith.addf %18, %23 : vector<128x64xf32>
    %25 = vector.extract_strided_slice %13 {offsets = [0, 2, 0], sizes = [8, 16, 32], strides = [1, 1, 1]} : vector<8x24x32xbf16> to vector<8x16x32xbf16>
    %26 = vector.shape_cast %25 : vector<8x16x32xbf16> to vector<128x32xbf16>
    %c2 = arith.constant 2 : index
    %c0_10 = arith.constant 0 : index
    %c0_11 = arith.constant 0 : index
    %27 = vector.load %arg4[%c2, %c0_10, %c0_11] : memref<3x32x64xbf16, #tpu.memory_space<vmem>>, vector<1x32x64xbf16>
    %28 = vector.shape_cast %27 : vector<1x32x64xbf16> to vector<32x64xbf16>
    %cst_12 = arith.constant dense<0.000000e+00> : vector<128x64xf32>
    %29 = tpu.matmul %26, %28, %cst_12 {dimension_numbers = #tpu.dot_dimension_numbers<[1], [0], [0], [1], [0, 0, 1, 1], [], []>} : vector<128x32xbf16>, vector<32x64xbf16>, vector<128x64xf32> -> vector<128x64xf32>
    %30 = arith.addf %24, %29 : vector<128x64xf32>
    %31 = vector.shape_cast %30 : vector<128x64xf32> to vector<8x16x64xf32>
    %c0_13 = arith.constant 0 : index
    %c0_14 = arith.constant 0 : index
    %32 = vector.load %arg5[%c0_13, %c0_14] : memref<16x64xf32, #tpu.memory_space<vmem>>, vector<16x64xf32>
    %33 = vector.shape_cast %32 : vector<16x64xf32> to vector<1x16x64xf32>
    %34 = vector.broadcast %33 : vector<1x16x64xf32> to vector<8x16x64xf32>
    %35 = arith.addf %31, %34 : vector<8x16x64xf32>
    %cst_15 = arith.constant dense<0xFF800000> : vector<8x64xf32>
    %36 = vector.multi_reduction <maximumf>, %35, %cst_15 [1] : vector<8x16x64xf32> to vector<8x64xf32>
    %c0_16 = arith.constant 0 : index
    %c0_17 = arith.constant 0 : index
    %37 = vector.load %arg6[%c0_16, %c0_17] : memref<1x64xf32, #tpu.memory_space<vmem>>, vector<1x64xf32>
    %38 = vector.broadcast %37 : vector<1x64xf32> to vector<8x64xf32>
    %39 = arith.addf %36, %38 : vector<8x64xf32>
    %cst_18 = arith.constant 0.000000e+00 : f32
    %40 = vector.broadcast %cst_18 : f32 to vector<8x64xf32>
    %41 = arith.maximumf %39, %40 : vector<8x64xf32>
    %42 = arith.truncf %41 : vector<8x64xf32> to vector<8x64xbf16>
    %c0_19 = arith.constant 0 : index
    %c0_20 = arith.constant 0 : index
    %43 = vector.load %arg7[%c0_19, %c0_20] : memref<64x128xbf16, #tpu.memory_space<vmem>>, vector<64x128xbf16>
    %cst_21 = arith.constant dense<0.000000e+00> : vector<8x128xf32>
    %44 = tpu.matmul %42, %43, %cst_21 {dimension_numbers = #tpu.dot_dimension_numbers<[1], [0], [0], [1], [0, 0, 1, 1], [], []>} : vector<8x64xbf16>, vector<64x128xbf16>, vector<8x128xf32> -> vector<8x128xf32>
    %c0_22 = arith.constant 0 : index
    %c0_23 = arith.constant 0 : index
    %45 = vector.load %arg8[%c0_22, %c0_23] : memref<1x128xf32, #tpu.memory_space<vmem>>, vector<1x128xf32>
    %46 = vector.broadcast %45 : vector<1x128xf32> to vector<8x128xf32>
    %47 = arith.addf %44, %46 : vector<8x128xf32>
    %48 = vector.extract_strided_slice %47 {offsets = [0, 0], sizes = [8, 64], strides = [1, 1]} : vector<8x128xf32> to vector<8x64xf32>
    %cst_24 = arith.constant 0.000000e+00 : f32
    %49 = vector.broadcast %cst_24 : f32 to vector<8x64xf32>
    %50 = arith.maximumf %48, %49 : vector<8x64xf32>
    %51 = vector.extract_strided_slice %47 {offsets = [0, 64], sizes = [8, 64], strides = [1, 1]} : vector<8x128xf32> to vector<8x64xf32>
    %52 = arith.negf %51 : vector<8x64xf32>
    %53 = math.exp %52 : vector<8x64xf32>
    %cst_25 = arith.constant 1.000000e+00 : f32
    %54 = vector.broadcast %cst_25 : f32 to vector<8x64xf32>
    %55 = arith.addf %54, %53 : vector<8x64xf32>
    %56 = arith.divf %54, %55 : vector<8x64xf32>
    %57 = arith.subf %41, %50 : vector<8x64xf32>
    %58 = arith.mulf %56, %57 : vector<8x64xf32>
    %59 = arith.addf %50, %58 : vector<8x64xf32>
    %c0_26 = arith.constant 0 : index
    %c0_27 = arith.constant 0 : index
    %60 = vector.load %arg2[%c0_26, %c0_27] : memref<8x1xi32, #tpu.memory_space<vmem>>, vector<8x1xi32>
    %61 = tpu.iota {dimensions = array<i32: 1>} : vector<1x128xi32>
    %62 = vector.broadcast %60 : vector<8x1xi32> to vector<8x128xi32>
    %63 = vector.broadcast %61 : vector<1x128xi32> to vector<8x128xi32>
    %64 = arith.cmpi eq, %62, %63 : vector<8x128xi32>
    %65 = arith.extui %64 : vector<8x128xi1> to vector<8x128xi32>
    %66 = arith.sitofp %65 : vector<8x128xi32> to vector<8x128xf32>
    %67 = arith.truncf %66 : vector<8x128xf32> to vector<8x128xbf16>
    %68 = arith.truncf %59 : vector<8x64xf32> to vector<8x64xbf16>
    %c0_28 = arith.constant 0 : index
    %c0_29 = arith.constant 0 : index
    %69 = vector.load %arg9[%c0_28, %c0_29] : memref<64x32xbf16, #tpu.memory_space<vmem>>, vector<64x32xbf16>
    %cst_30 = arith.constant dense<0.000000e+00> : vector<8x32xf32>
    %70 = tpu.matmul %68, %69, %cst_30 {dimension_numbers = #tpu.dot_dimension_numbers<[1], [0], [0], [1], [0, 0, 1, 1], [], []>} : vector<8x64xbf16>, vector<64x32xbf16>, vector<8x32xf32> -> vector<8x32xf32>
    %c0_31 = arith.constant 0 : index
    %c0_32 = arith.constant 0 : index
    %71 = vector.load %arg10[%c0_31, %c0_32] : memref<128x32xbf16, #tpu.memory_space<vmem>>, vector<128x32xbf16>
    %cst_33 = arith.constant dense<0.000000e+00> : vector<8x32xf32>
    %72 = tpu.matmul %67, %71, %cst_33 {dimension_numbers = #tpu.dot_dimension_numbers<[1], [0], [0], [1], [0, 0, 1, 1], [], []>} : vector<8x128xbf16>, vector<128x32xbf16>, vector<8x32xf32> -> vector<8x32xf32>
    %73 = arith.addf %70, %72 : vector<8x32xf32>
    %c0_34 = arith.constant 0 : index
    %c0_35 = arith.constant 0 : index
    %74 = vector.load %arg11[%c0_34, %c0_35] : memref<1x32xf32, #tpu.memory_space<vmem>>, vector<1x32xf32>
    %75 = vector.broadcast %74 : vector<1x32xf32> to vector<8x32xf32>
    %76 = arith.addf %73, %75 : vector<8x32xf32>
    %c0_36 = arith.constant 0 : index
    %c0_37 = arith.constant 0 : index
    %77 = vector.load %arg12[%c0_36, %c0_37] : memref<8x32xf32, #tpu.memory_space<vmem>>, vector<8x32xf32>
    tpu.vector_store %arg12[%c0_36, %c0_37], %76 {strides = array<i32>} : memref<8x32xf32, #tpu.memory_space<vmem>>, vector<8x32xf32>,
    return
  }
  func.func @transform_0(%arg0: i32) -> (i32, i32) {
    %c0_i32 = arith.constant 0 : i32
    %c0_i32_0 = arith.constant 0 : i32
    return %arg0, %c0_i32 : i32, i32
  }
  func.func @transform_1(%arg0: i32) -> (i32, i32) {
    %c0_i32 = arith.constant 0 : i32
    %c0_i32_0 = arith.constant 0 : i32
    return %arg0, %c0_i32 : i32, i32
  }
  func.func @transform_2(%arg0: i32) -> (i32, i32) {
    %c0_i32 = arith.constant 0 : i32
    %c0_i32_0 = arith.constant 0 : i32
    %c0_i32_1 = arith.constant 0 : i32
    return %c0_i32, %c0_i32_0 : i32, i32
  }
  func.func @transform_3(%arg0: i32) -> (i32, i32, i32) {
    %c0_i32 = arith.constant 0 : i32
    %c0_i32_0 = arith.constant 0 : i32
    %c0_i32_1 = arith.constant 0 : i32
    %c0_i32_2 = arith.constant 0 : i32
    return %c0_i32, %c0_i32_0, %c0_i32_1 : i32, i32, i32
  }
  func.func @transform_4(%arg0: i32) -> (i32, i32) {
    %c0_i32 = arith.constant 0 : i32
    %c0_i32_0 = arith.constant 0 : i32
    %c0_i32_1 = arith.constant 0 : i32
    return %c0_i32, %c0_i32_0 : i32, i32
  }
  func.func @transform_5(%arg0: i32) -> (i32, i32) {
    %c0_i32 = arith.constant 0 : i32
    %c0_i32_0 = arith.constant 0 : i32
    %c0_i32_1 = arith.constant 0 : i32
    return %c0_i32, %c0_i32_0 : i32, i32
  }
  func.func @transform_6(%arg0: i32) -> (i32, i32) {
    %c0_i32 = arith.constant 0 : i32
    %c0_i32_0 = arith.constant 0 : i32
    %c0_i32_1 = arith.constant 0 : i32
    return %c0_i32, %c0_i32_0 : i32, i32
  }
  func.func @transform_7(%arg0: i32) -> (i32, i32) {
    %c0_i32 = arith.constant 0 : i32
    %c0_i32_0 = arith.constant 0 : i32
    %c0_i32_1 = arith.constant 0 : i32
    return %c0_i32, %c0_i32_0 : i32, i32
  }
  func.func @transform_8(%arg0: i32) -> (i32, i32) {
    %c0_i32 = arith.constant 0 : i32
    %c0_i32_0 = arith.constant 0 : i32
    %c0_i32_1 = arith.constant 0 : i32
    return %c0_i32, %c0_i32_0 : i32, i32
  }
  func.func @transform_9(%arg0: i32) -> (i32, i32) {
    %c0_i32 = arith.constant 0 : i32
    %c0_i32_0 = arith.constant 0 : i32
    %c0_i32_1 = arith.constant 0 : i32
    return %c0_i32, %c0_i32_0 : i32, i32
  }
  func.func @transform_10(%arg0: i32) -> (i32, i32) {
    %c0_i32 = arith.constant 0 : i32
    %c0_i32_0 = arith.constant 0 : i32
    %c0_i32_1 = arith.constant 0 : i32
    return %c0_i32, %c0_i32_0 : i32, i32
  }
  func.func @transform_11(%arg0: i32) -> (i32, i32) {
    %c0_i32 = arith.constant 0 : i32
    %c0_i32_0 = arith.constant 0 : i32
    return %arg0, %c0_i32 : i32, i32
  }
}

</mosaic_0001>

<bundles_post_ra>
// kernel: tpu_custom_call.1
= control target key start
LH: loop header
LB: loop body
LE: loop exit
PB: predicated region body
PF: predicated region fallthrough
CT: control target
= control target key end

     0   :  { %s3115_s0 = inlined_call_operand.vmem [shape: s32[16,24], index: 0, kind: input, shape index: {}]   ;;  %s3116_s1 = inlined_call_operand.vmem [shape: s32[16,1], index: 1, kind: input, shape index: {}]   ;;  %s3117_s2 = inlined_call_operand.vmem [shape: bf16[128,32], index: 2, kind: input, shape index: {}]   ;;  %s3118_s3 = inlined_call_operand.vmem [shape: bf16[3,32,64], index: 3, kind: input, shape index: {}]   ;;  %s3119_s4 = inlined_call_operand.vmem [shape: f32[16,64], index: 4, kind: input, shape index: {}]   ;;  %s3120_s5 = inlined_call_operand.vmem [shape: f32[1,64], index: 5, kind: input, shape index: {}]   ;;  %s3121_s6 = inlined_call_operand.vmem [shape: bf16[64,128], index: 6, kind: input, shape index: {}]   ;;  %s3122_s7 = inlined_call_operand.vmem [shape: f32[1,128], index: 7, kind: input, shape index: {}]   ;;  %s3123_s8 = inlined_call_operand.vmem [shape: bf16[64,32], index: 8, kind: input, shape index: {}]   ;;  %s3124_s9 = inlined_call_operand.vmem [shape: bf16[128,32], index: 9, kind: input, shape index: {}]   ;;  %s3125_s10 = inlined_call_operand.vmem [shape: f32[1,32], index: 10, kind: input, shape index: {}]   ;;  %s3126_s11 = inlined_call_operand.hbm [shape: f32[16,32], index: 11, kind: output, shape index: {}]  }
   0x1   :  { %3127 = sst [smem:[#allocation5_spill]] %s3115_s0 }
   0x2   :  { %16 = vsyncpa [#allocation3], 0 }
   0x3   :  { %18 = vsyncpa [#allocation3 + $0x1], 0  ;;  %s2581_s17 = smov 0   ;;  %s2583_s18 = smov 0  }
   0x4   :  { %s2585_s19 = smov 0   ;;  %s2587_s20 = smov 0  }
   0x5 LB: > { %s2602_s21 = sadd.s32 4294967295, %s2513_s20   ;;  %s2030_s22 = sadd.s32 4294967294, %s2513_s20   ;;  %s2513_s20 = sphi %s2587_s20, %s3134_s20   ;;  %s2509_s19 = sphi %s2585_s19, %s3133_s19   ;;  %s2505_s18 = sphi %s2583_s18, %s3132_s18   ;;  %s2501_s17 = sphi %s2581_s17, %s3131_s17  }
   0x6   : > { %s2606_s23 = sadd.s32 1, %s2513_s20   ;;  %s272_s24 = sadd.s32 1, %s2509_s19 }
   0x7   : > { %s269_s25 = ssub.s32 %s2513_s20, %s2606_s23  ;;  %p282_p0 = scmp.ne.s32.totalorder %s2509_s19, %s2505_s18 }
   0x8   : > { %p270_p1 = scmp.eq.s32.totalorder %s269_s25, 0  ;;  %p283_p2 = scmp.eq.s32.totalorder %s2602_s21, 1 }
   0x9   : > { %p288_p3 = scmp.ne.s32.totalorder %s2505_s18, %s2501_s17  ;;  %p289_p4 = scmp.eq.s32.totalorder %s2030_s22, 1 }
   0xa   : > { %s2617_s26 = scalar_select %p270_p1, %s2509_s19, %s272_s24  }
   0xb   : > { %p2619_p5 = por %p283_p2, %p282_p0  ;;  %p2623_p6 = por %p289_p4, %p288_p3 }
   0xc   : > { %p2033_p7 = scmp.ge.s32.totalorder %s2513_s20, 1  ;;  %p348_p8 = scmp.lt.s32.totalorder %s2513_s20, 3 }
   0xe   : > { %p349_p9 = pnand %p2033_p7, %p348_p8 }
   0xf   : > { %p391_p10 = scmp.lt.s32.totalorder (!%p349_p9), %s2602_s21, 1  ;;  %s3130_s0 = sld [smem:[#allocation5_spill]] (!%p349_p9) }
  0x10   : > { %352 = sbr.rel (%p349_p9) target bundleno = 1358 (0x54e), region = 64  ;;  %s2519_s16 = smov (!%p349_p9), 64  }
  0x11   : > { %s388_s24 = sand.u32 (!%p349_p9), 1, %s2505_s18  }
  0x15   : > { %v401_v0 = vlaneseq  ;;  %v2419_v1 = vld [vmem:[%s3117_s2 + $0x38] sm:$0xff]   ;;  %v2420_v2 = vld [vmem:[%s3117_s2 + $0x30] sm:$0xff]   ;;  %s2637_s14 = scalar_select %p391_p10, %s2602_s21, 1  ;;  %v2421_v5 = vld [vmem:[%s3117_s2 + $0x28] sm:$0xff]   ;;  %v2515_v22 = vmov 0.0  }
  0x16   : > { %2229 = vmatprep.subr.bf16.mxu0 %v2419_v1  ;;  %v2422_v11 = vld [vmem:[%s3117_s2 + $0x20] sm:$0xff]   ;;  %v2423_v14 = vld [vmem:[%s3117_s2 + $0x18] sm:$0xff]   ;;  %v2424_v15 = vld [vmem:[%s3117_s2 + $0x10] sm:$0xff]   ;;  %v2516_v34 = vmov 1.0|1.0  }
  0x17   : > { %v2640_v3 = vshrl.u32 %v401_v0, 7  ;;  %2230 = vmatpush3.bf16.msra.mxu0 %v2419_v1  ;;  %s2035_s15 = sshll.u32 %s2637_s14, 3  ;;  %v2425_v17 = vld [vmem:[%s3117_s2 + $0x8] sm:$0xff]   ;;  %v2426_v19 = vld [vmem:[%s3117_s2] sm:$0xff]   ;;  %v2676_v30 = vand.u32 127, %v401_v0  ;;  %s2145_s14 = sshll.u32 %s2602_s21, 7 }
  0x18   : > { %2231 = vmatprep.subr.bf16.mxu0 %v2420_v2  ;;  %s394_s29 = scalar_lea.vmem %s3130_s0, %s2035_s15  ;;  %s398_s25 = scalar_lea.vmem %s3116_s1, %s2035_s15 }
  0x19   : > { %v403_v4 = vsub.s32 0, %v2640_v3  ;;  %v418_v6 = vsub.s32 1, %v2640_v3  ;;  %v400_v7 = vld [vmem:[%s394_s29] sm:$0xff]  ;;  %v433_v9 = vsub.s32 2, %v2640_v3  ;;  %v448_v10 = vsub.s32 3, %v2640_v3  ;;  %s3073_s22 = scalar_lea.hbm %s3126_s11, %s2145_s14  ;;  %s1946_s21 = scalar_lea.sflag [#allocation3], %s388_s24 }
  0x1a   : > { %v463_v13 = vsub.s32 4, %v2640_v3  ;;  %v478_v21 = vsub.s32 5, %v2640_v3  ;;  %v493_v24 = vsub.s32 6, %v2640_v3  ;;  %v508_v26 = vsub.s32 7, %v2640_v3  ;;  %s2520_s29 = smov [#allocation2]  }
  0x1b   : > { %v404_v8 = vrot.slane %v400_v7, %v403_v4  ;;  %2232 = vmatpush3.bf16.msra.mxu0 %v2420_v2  ;;  %v419_v12 = vrot.slane %v400_v7, %v418_v6  ;;  %v434_v16 = vrot.slane %v400_v7, %v433_v9  ;;  %v449_v18 = vrot.slane %v400_v7, %v448_v10  ;;  %s2457_s30 = sshll.u32 %s2520_s29, 4  ;;  %s2458_s30 = int_to_ptr.vmem [resolvable:$false] %s2457_s30 }
  0x1c   : > { %2233 = vmatprep.subr.bf16.mxu0 %v2421_v5  ;;  %v464_v20 = vrot.slane %v400_v7, %v463_v13  ;;  %v479_v23 = vrot.slane %v400_v7, %v478_v21  ;;  %v494_v25 = vrot.slane %v400_v7, %v493_v24  ;;  %v509_v27 = vrot.slane %v400_v7, %v508_v26  ;;  %v2428_v24 = vld [vmem:[%s3118_s3 + $0x10] sm:$0xff]   ;;  %s2459_s14 = scalar_lea.vmem %s2458_s30, 256 }
  0x1d   : > { %414 = vbcast.lane.b32.xlu1 %v404_v8, 272  ;;  %406 = vbcast.lane.b32.xlu0 %v404_v8, 256 }
  0x1f   : > { %2234 = vmatpush3.bf16.msra.mxu0 %v2421_v5 }
  0x20   : > { %2235 = vmatprep.subr.bf16.mxu0 %v2422_v11 }
  0x21   : > { %421 = vbcast.lane.b32.xlu1 %v419_v12, 256  ;;  %410 = vbcast.lane.b32.xlu0 %v404_v8, 264 }
  0x23   : > { %2236 = vmatpush3.bf16.msra.mxu0 %v2422_v11 }
  0x24   : > { %2237 = vmatprep.subr.bf16.mxu0 %v2423_v14 }
  0x25   : > { %429 = vbcast.lane.b32.xlu1 %v419_v12, 272  ;;  %425 = vbcast.lane.b32.xlu0 %v419_v12, 264 }
  0x27   : > { %2238 = vmatpush3.bf16.msra.mxu0 %v2423_v14 }
  0x28   : > { %2239 = vmatprep.subr.bf16.mxu0 %v2424_v15 }
  0x29   : > { %440 = vbcast.lane.b32.xlu1 %v434_v16, 264  ;;  %436 = vbcast.lane.b32.xlu0 %v434_v16, 256 }
  0x2b   : > { %2240 = vmatpush3.bf16.msra.mxu0 %v2424_v15 }
  0x2c   : > { %2241 = vmatprep.subr.bf16.mxu0 %v2425_v17 }
  0x2d   : > { %455 = vbcast.lane.b32.xlu1 %v449_v18, 264  ;;  %451 = vbcast.lane.b32.xlu0 %v449_v18, 256 }
  0x2f   : > { %2242 = vmatpush3.bf16.msra.mxu0 %v2425_v17 }
  0x30   : > { %2243 = vmatprep.subr.bf16.mxu0 %v2426_v19 }
  0x31   : > { %444 = vbcast.lane.b32.xlu1 %v434_v16, 272  ;;  %459 = vbcast.lane.b32.xlu0 %v449_v18, 272 }
  0x33   : > { %2244 = vmatpush3.bf16.msra.mxu0 %v2426_v19 }
  0x34   : > { %2329 = vmatprep.subr.bf16.mxu0 %v2515_v22 }
  0x35   : > { %470 = vbcast.lane.b32.xlu1 %v464_v20, 264  ;;  %466 = vbcast.lane.b32.xlu0 %v464_v20, 256 }
  0x39   : > { %481 = vbcast.lane.b32.xlu1 %v479_v23, 256  ;;  %474 = vbcast.lane.b32.xlu0 %v464_v20, 272 }
  0x3d   : > { %489 = vbcast.lane.b32.xlu1 %v479_v23, 272  ;;  %485 = vbcast.lane.b32.xlu0 %v479_v23, 264  ;;  %v2427_v23 = vld [vmem:[%s3118_s3 + $0x18] sm:$0xff]  }
  0x3e   : > { %2269 = vmatprep.subr.bf16.mxu1 %v2427_v23 }
  0x3f   : > { %2270 = vmatpush3.bf16.msra.mxu1 %v2427_v23 }
  0x40   : > { %2271 = vmatprep.subr.bf16.mxu1 %v2428_v24 }
  0x41   : > { %500 = vbcast.lane.b32.xlu1 %v494_v25, 264  ;;  %496 = vbcast.lane.b32.xlu0 %v494_v25, 256 }
  0x43   : > { %2272 = vmatpush3.bf16.msra.mxu1 %v2428_v24 }
  0x45   : > { %515 = vbcast.lane.b32.xlu1 %v509_v27, 264  ;;  %511 = vbcast.lane.b32.xlu0 %v509_v27, 256 }
  0x49   : > { %504 = vbcast.lane.b32.xlu1 %v494_v25, 272  ;;  %519 = vbcast.lane.b32.xlu0 %v509_v27, 272  ;;  %v2429_v25 = vld [vmem:[%s3118_s3 + $0x8] sm:$0xff]  }
  0x4a   : > { %2289 = vmatprep.subr.bf16.mxu1 %v2429_v25 }
  0x8f   : > { %v415_v28 = vpop.permute.xlu1 %414  ;;  %v407_v29 = vpop.permute.xlu0 %406 }
  0x90   : > { %vm525_vm0 = vcmp.eq.s32.totalorder %v415_v28, %v2676_v30  ;;  %vm523_vm3 = vcmp.eq.s32.totalorder %v407_v29, %v2676_v30 }
  0x93   : > { %v422_v31 = vpop.permute.xlu1 %421  ;;  %v411_v32 = vpop.permute.xlu0 %410 }
  0x94   : > { %vm526_vm1 = vcmp.eq.s32.totalorder %v422_v31, %v2676_v30  ;;  %vm524_vm2 = vcmp.eq.s32.totalorder %v411_v32, %v2676_v30 }
  0x95   : > { %vm2152_vm4 = vmpackc.low %vm526_vm1, %vm525_vm0  ;;  %v2040_v33 = vsel %vm526_vm1, 1.0, %v2515_v22 }
  0x96   : > { %vm2073_vm5 = vmpackc.low %vm524_vm2, %vm523_vm3 }
  0x97   : > { %2245 = vmatprep.mubr.msk.bf16.mxu0 %vm2073_vm5, %v2516_v34  ;;  %v430_v35 = vpop.permute.xlu1 %429  ;;  %v426_v36 = vpop.permute.xlu0 %425 }
  0x98   : > { %vm528_vm6 = vcmp.eq.s32.totalorder %v430_v35, %v2676_v30  ;;  %2246 = vmatmul.mubr.msk.bf16.vlgmr.msra.gmra.mxu0 %vm2152_vm4, %v2516_v34  ;;  %vm527_vm7 = vcmp.eq.s32.totalorder %v426_v36, %v2676_v30 }
  0x99   : > { %v2042_v37 = vsel %vm528_vm6, 1.0, %v2515_v22  ;;  %v2041_v38 = vsel %vm527_vm7, 1.0, %v2515_v22 }
  0x9a   : > { %v598_v39 = vpack.c.bf16 %v2042_v37, %v2042_v37  ;;  %v597_v40 = vpack.c.bf16 %v2041_v38, %v2040_v33 }
  0x9b   : > { %v441_v41 = vpop.permute.xlu1 %440  ;;  %v437_v42 = vpop.permute.xlu0 %436 }
  0x9c   : > { %v632_v43 = vunpack.c.l.b16 %v598_v39  ;;  %v631_v44 = vunpack.c.h.b16 %v597_v40  ;;  %vm530_vm8 = vcmp.eq.s32.totalorder %v441_v41, %v2676_v30  ;;  %vm529_vm9 = vcmp.eq.s32.totalorder %v437_v42, %v2676_v30 }
  0x9d   : > { %vm2075_vm10 = vmpackc.low %vm530_vm8, %vm529_vm9 }
  0x9e   : > { %v669_v45 = vpack.c.b16 %v632_v43, %v631_v44 }
  0x9f   : > { %v456_v46 = vpop.permute.xlu1 %455  ;;  %v452_v47 = vpop.permute.xlu0 %451 }
  0xa0   : > { %vm533_vm11 = vcmp.eq.s32.totalorder %v456_v46, %v2676_v30  ;;  %vm532_vm12 = vcmp.eq.s32.totalorder %v452_v47, %v2676_v30  ;;  %2249 = vmatprep.mubr.bf16.mxu0 %v669_v45 }
  0xa1   : > { %v2047_v48 = vsel %vm533_vm11, 1.0, %v2515_v22  ;;  %v2046_v49 = vsel %vm532_vm12, 1.0, %v2515_v22  ;;  %2250 = vmatmul.mubr.msk.bf16.gmra.mxu0 %vm2075_vm10, %v2516_v34 }
  0xa2   : > { %v601_v52 = vpack.c.bf16 %v2047_v48, %v2046_v49 }
  0xa3   : > { %v445_v50 = vpop.permute.xlu1 %444  ;;  %v460_v51 = vpop.permute.xlu0 %459 }
  0xa4   : > { %vm531_vm13 = vcmp.eq.s32.totalorder %v445_v50, %v2676_v30  ;;  %vm534_vm14 = vcmp.eq.s32.totalorder %v460_v51, %v2676_v30  ;;  %v637_v57 = vunpack.c.h.b16 %v601_v52 }
  0xa5   : > { %vm2154_vm15 = vmpackc.low %vm532_vm12, %vm531_vm13  ;;  %v2048_v53 = vsel %vm534_vm14, 1.0, %v2515_v22 }
  0xa6   : > { %v602_v54 = vpack.c.bf16 %v2048_v53, %v2048_v53  ;;  %2253 = vmatprep.mubr.msk.bf16.mxu0 %vm2154_vm15, %v2516_v34 }
  0xa7   : > { %v471_v55 = vpop.permute.xlu1 %470  ;;  %v467_v56 = vpop.permute.xlu0 %466 }
  0xa8   : > { %v638_v58 = vunpack.c.l.b16 %v602_v54  ;;  %vm536_vm0 = vcmp.eq.s32.totalorder %v471_v55, %v2676_v30  ;;  %vm535_vm1 = vcmp.eq.s32.totalorder %v467_v56, %v2676_v30 }
  0xa9   : > { %vm2077_vm2 = vmpackc.low %vm536_vm0, %vm535_vm1  ;;  %vm1265_vm0 = vcmask 1046528   ;;  %vm888_vm1 = vsmask.f32 7424 }
  0xaa   : > { %v672_v59 = vpack.c.b16 %v638_v58, %v637_v57 }
  0xab   : > { %v482_v60 = vpop.permute.xlu1 %481  ;;  %v475_v61 = vpop.permute.xlu0 %474 }
  0xac   : > { %2254 = vmatmul.mubr.bf16.gmra.mxu0 %v672_v59  ;;  %vm538_vm3 = vcmp.eq.s32.totalorder %v482_v60, %v2676_v30  ;;  %vm537_vm4 = vcmp.eq.s32.totalorder %v475_v61, %v2676_v30 }
  0xad   : > { %2257 = vmatprep.mubr.msk.bf16.mxu0 %vm2077_vm2, %v2516_v34  ;;  %v2052_v62 = vsel %vm538_vm3, 1.0, %v2515_v22  ;;  %vm2156_vm7 = vmpackc.low %vm538_vm3, %vm537_vm4  ;;  %vm1002_vm2 = vcmask 261120   ;;  %vm2517_vm3 = vmmov 0   ;;  %vm1462_vm4 = vcmask 523264  }
  0xaf   : > { %v490_v63 = vpop.permute.xlu1 %489  ;;  %v486_v0 = vpop.permute.xlu0 %485 }
  0xb0   : > { %vm540_vm5 = vcmp.eq.s32.totalorder %v490_v63, %v2676_v30  ;;  %vm539_vm6 = vcmp.eq.s32.totalorder %v486_v0, %v2676_v30 }
  0xb1   : > { %v2054_v1 = vsel %vm540_vm5, 1.0, %v2515_v22  ;;  %v2053_v2 = vsel %vm539_vm6, 1.0, %v2515_v22  ;;  %vm1598_vm5 = vcmask 1041409   ;;  %vm1601_vm6 = vcmask 1042434  }
  0xb2   : > { %v606_v3 = vpack.c.bf16 %v2054_v1, %v2054_v1  ;;  %v605_v4 = vpack.c.bf16 %v2053_v2, %v2052_v62  ;;  %v2430_v62 = vld [vmem:[%s3118_s3] sm:$0xff]  }
  0xb3   : > { %v501_v5 = vpop.permute.xlu1 %500  ;;  %v497_v6 = vpop.permute.xlu0 %496 }
  0xb4   : > { %v644_v7 = vunpack.c.l.b16 %v606_v3  ;;  %v643_v8 = vunpack.c.h.b16 %v605_v4  ;;  %2258 = vmatmul.mubr.msk.bf16.gmra.mxu0 %vm2156_vm7, %v2516_v34  ;;  %vm542_vm8 = vcmp.eq.s32.totalorder %v501_v5, %v2676_v30  ;;  %vm541_vm9 = vcmp.eq.s32.totalorder %v497_v6, %v2676_v30 }
  0xb5   : > { %vm2079_vm12 = vmpackc.low %vm542_vm8, %vm541_vm9  ;;  %vm1604_vm7 = vcmask 1043459   ;;  %vm1607_vm8 = vcmask 1044484   ;;  %vm1610_vm9 = vcmask 1045509  }
  0xb6   : > { %v675_v9 = vpack.c.b16 %v644_v7, %v643_v8  ;;  %v2760_v7 = vld [vmem:[%s3118_s3 + $0x28] sm:$0xff]  }
  0xb7   : > { %v516_v10 = vpop.permute.xlu1 %515  ;;  %v512_v11 = vpop.permute.xlu0 %511 }
  0xb8   : > { %vm545_vm10 = vcmp.eq.s32.totalorder %v516_v10, %v2676_v30  ;;  %vm544_vm11 = vcmp.eq.s32.totalorder %v512_v11, %v2676_v30  ;;  %2261 = vmatprep.mubr.bf16.mxu0 %v675_v9 }
  0xb9   : > { %v2059_v12 = vsel %vm545_vm10, 1.0, %v2515_v22  ;;  %v2058_v13 = vsel %vm544_vm11, 1.0, %v2515_v22  ;;  %vm1613_vm10 = vcmask 1046534  }
  0xba   : > { %v609_v16 = vpack.c.bf16 %v2059_v12, %v2058_v13 }
  0xbb   : > { %v505_v14 = vpop.permute.xlu1 %504  ;;  %v520_v15 = vpop.permute.xlu0 %519 }
  0xbc   : > { %vm543_vm13 = vcmp.eq.s32.totalorder %v505_v14, %v2676_v30  ;;  %vm546_vm14 = vcmp.eq.s32.totalorder %v520_v15, %v2676_v30  ;;  %2262 = vmatmul.mubr.msk.bf16.gmra.mxu0 %vm2079_vm12, %v2516_v34  ;;  %v649_v19 = vunpack.c.h.b16 %v609_v16 }
  0xbd   : > { %vm2158_vm15 = vmpackc.low %vm544_vm11, %vm543_vm13  ;;  %v2060_v17 = vsel %vm546_vm14, 1.0, %v2515_v22  ;;  %vm1616_vm11 = vcmask 1047559  }
  0xbe   : > { %v610_v18 = vpack.c.bf16 %v2060_v17, %v2060_v17  ;;  %2265 = vmatprep.mubr.msk.bf16.mxu0 %vm2158_vm15, %v2516_v34 }
  0xc0   : > { %v650_v20 = vunpack.c.l.b16 %v610_v18 }
  0xc2   : > { %v678_v21 = vpack.c.b16 %v650_v20, %v649_v19 }
  0xc4   : > { %2266 = vmatmul.mubr.bf16.gmra.mxu0 %v678_v21 }
  0xc5   : > { %2337 = vmatprep.mubr.msk.bf16.mxu0 %vm2517_vm3, %v2515_v22 }
 0x158   : > { %v2247_v26 = vpop.f32.mrf.mxu0 }
 0x159   : > { %v869_v29 = vpack.c.bf16 %v2247_v26, %v2247_v26 }
 0x15a   : > { %v773_v27 = vpop.f32.mrf.mxu0 }
 0x15b   : > { %v897_v33 = vshll.u32 %v869_v29, 16  ;;  %v1267_v35 = vrot.slane %v869_v29, 1 }
 0x15c   : > { %v2248_v28 = vpop.f32.mrf.mxu0 }
 0x15d   : > { %v899_v44 = vrot.slane %v897_v33, 1 }
 0x15e   : > { %v776_v31 = vpop.f32.mrf.mxu0 }
 0x15f   : > { %v2731_v32 = vpack.c.bf16 %v776_v31, %v773_v27 }
 0x161   : > { %v2251_v36 = vpop.f32.mrf.mxu0  ;;  %v892_v37 = vshll.u32 %v2731_v32, 16  ;;  %v1266_v38 = vrot.slane %v2731_v32, 1  ;;  %v890_v40 = vshrl.u32 %v2731_v32, 16 }
 0x163   : > { %v789_v39 = vpop.f32.mrf.mxu0  ;;  %v894_v41 = vrot.slane %v892_v37, 1  ;;  %v2737_v42 = vsel %vm1265_vm0, %v1266_v38, %v1267_v35 }
 0x164   : > { %v2739_v43 = vpack.c.bf16 %v789_v39, %v2248_v28 }
 0x165   : > { %v2252_v45 = vpop.f32.mrf.mxu0  ;;  %v895_v46 = vor.u32 %v894_v41, %v890_v40 }
 0x166   : > { %v904_v47 = vshll.u32 %v2739_v43, 16  ;;  %v2743_v51 = vpack.c.bf16 %v2252_v45, %v2251_v36  ;;  %v902_v53 = vshrl.u32 %v2739_v43, 16  ;;  %v1269_v54 = vrot.slane %v2739_v43, 1 }
 0x167   : > { %v792_v48 = vpop.f32.mrf.mxu0  ;;  %v900_v49 = vsel %vm888_vm1, %v895_v46, %v899_v44 }
 0x168   : > { %v906_v50 = vrot.slane %v904_v47, 1  ;;  %v871_v52 = vpack.c.bf16 %v792_v48, %v792_v48  ;;  %2273 = vmatprep.mubr.msk.bf16.mxu1 %vm1002_vm2, %v900_v49  ;;  %v916_v57 = vshll.u32 %v2743_v51, 16  ;;  %v914_v8 = vshrl.u32 %v2743_v51, 16 }
 0x169   : > { %v1272_v10 = vrot.slane %v2743_v51, 1 }
 0x16a   : > { %v909_v55 = vshll.u32 %v871_v52, 16  ;;  %v1270_v56 = vrot.slane %v871_v52, 1  ;;  %v907_v61 = vor.u32 %v906_v50, %v902_v53  ;;  %v918_v2 = vrot.slane %v916_v57, 1 }
 0x16c   : > { %v911_v58 = vrot.slane %v909_v55, 1  ;;  %v2750_v59 = vsel %vm1265_vm0, %v1269_v54, %v1270_v56  ;;  %v2255_v60 = vpop.f32.mrf.mxu0  ;;  %v919_v14 = vor.u32 %v918_v2, %v914_v8 }
 0x16e   : > { %v805_v63 = vpop.f32.mrf.mxu0  ;;  %v912_v0 = vsel %vm888_vm1, %v907_v61, %v911_v58 }
 0x16f   : > { %v873_v1 = vpack.c.bf16 %v805_v63, %v805_v63  ;;  %2274 = vmatmul.mubr.msk.bf16.vlgmr.msra.gmra.mxu1 %vm1002_vm2, %v912_v0 }
 0x170   : > { %v2256_v3 = vpop.f32.mrf.mxu0  ;;  %2290 = vmatpush3.bf16.msra.mxu1 %v2429_v25 }
 0x171   : > { %v921_v4 = vshll.u32 %v873_v1, 16  ;;  %v1273_v5 = vrot.slane %v873_v1, 1  ;;  %v875_v6 = vpack.c.bf16 %v2256_v3, %v2256_v3  ;;  %2291 = vmatprep.subr.bf16.mxu1 %v2430_v62 }
 0x172   : > { %v808_v9 = vpop.f32.mrf.mxu0 }
 0x173   : > { %v923_v11 = vrot.slane %v921_v4, 1  ;;  %v2764_v12 = vpack.c.bf16 %v2255_v60, %v808_v9  ;;  %v2767_v15 = vsel %vm1265_vm0, %v1272_v10, %v1273_v5  ;;  %v933_v16 = vshll.u32 %v875_v6, 16 }
 0x174   : > { %v2259_v13 = vpop.f32.mrf.mxu0  ;;  %2292 = vmatpush3.bf16.msra.mxu1 %v2430_v62  ;;  %v1276_v18 = vrot.slane %v875_v6, 1 }
 0x175   : > { %v928_v17 = vshll.u32 %v2764_v12, 16  ;;  %2309 = vmatprep.subr.bf16.mxu1 %v2760_v7  ;;  %v924_v20 = vsel %vm888_vm1, %v919_v14, %v923_v11  ;;  %v1275_v21 = vrot.slane %v2764_v12, 1  ;;  %v926_v23 = vshrl.u32 %v2764_v12, 16 }
 0x176   : > { %v821_v19 = vpop.f32.mrf.mxu0  ;;  %2277 = vmatprep.mubr.msk.bf16.mxu1 %vm1002_vm2, %v924_v20  ;;  %v935_v27 = vrot.slane %v933_v16, 1  ;;  %v877_v28 = vpack.c.bf16 %v2259_v13, %v2259_v13 }
 0x177   : > { %v930_v24 = vrot.slane %v928_v17, 1  ;;  %v2776_v26 = vsel %vm1265_vm0, %v1275_v21, %v1276_v18 }
 0x178   : > { %v2260_v25 = vpop.f32.mrf.mxu0  ;;  %v1279_v37 = vrot.slane %v877_v28, 1  ;;  %v945_v40 = vshll.u32 %v877_v28, 16 }
 0x179   : > { %v931_v29 = vor.u32 %v930_v24, %v926_v23 }
 0x17a   : > { %v824_v31 = vpop.f32.mrf.mxu0  ;;  %v947_v53 = vrot.slane %v945_v40, 1 }
 0x17b   : > { %v2778_v33 = vpack.c.bf16 %v824_v31, %v821_v19  ;;  %v936_v35 = vsel %vm888_vm1, %v931_v29, %v935_v27 }
 0x17c   : > { %v2263_v36 = vpop.f32.mrf.mxu0  ;;  %2278 = vmatmul.mubr.msk.bf16.gmra.mxu1 %vm1002_vm2, %v936_v35 }
 0x17d   : > { %v940_v38 = vshll.u32 %v2778_v33, 16  ;;  %v1278_v39 = vrot.slane %v2778_v33, 1  ;;  %v938_v44 = vshrl.u32 %v2778_v33, 16 }
 0x17e   : > { %v837_v41 = vpop.f32.mrf.mxu0 }
 0x17f   : > { %v942_v45 = vrot.slane %v940_v38, 1  ;;  %v878_v46 = vpack.c.bf16 %v837_v41, %v2260_v25  ;;  %v2786_v47 = vsel %vm1265_vm0, %v1278_v39, %v1279_v37  ;;  %v2432_v39 = vld [vmem:[%s3118_s3 + $0x20] sm:$0xff]  }
 0x180   : > { %v2264_v48 = vpop.f32.mrf.mxu0 }
 0x181   : > { %v952_v49 = vshll.u32 %v878_v46, 16  ;;  %v880_v50 = vpack.c.bf16 %v2264_v48, %v2263_v36  ;;  %v943_v52 = vor.u32 %v942_v45, %v938_v44  ;;  %v950_v61 = vshrl.u32 %v878_v46, 16 }
 0x182   : > { %v840_v54 = vpop.f32.mrf.mxu0  ;;  %v1281_v0 = vrot.slane %v878_v46, 1 }
 0x183   : > { %v954_v55 = vrot.slane %v952_v49, 1  ;;  %v964_v56 = vshll.u32 %v880_v50, 16  ;;  %v879_v57 = vpack.c.bf16 %v840_v54, %v840_v54  ;;  %v948_v60 = vsel %vm888_vm1, %v943_v52, %v947_v53 }
 0x184   : > { %v2267_v58 = vpop.f32.mrf.mxu0  ;;  %2281 = vmatprep.mubr.msk.bf16.mxu1 %vm1002_vm2, %v948_v60  ;;  %v962_v8 = vshrl.u32 %v880_v50, 16  ;;  %v1284_v17 = vrot.slane %v880_v50, 1 }
 0x185   : > { %v957_v62 = vshll.u32 %v879_v57, 16  ;;  %v1282_v63 = vrot.slane %v879_v57, 1  ;;  %v966_v1 = vrot.slane %v964_v56, 1  ;;  %v955_v5 = vor.u32 %v954_v55, %v950_v61 }
 0x186   : > { %v853_v2 = vpop.f32.mrf.mxu0 }
 0x187   : > { %v959_v3 = vrot.slane %v957_v62, 1  ;;  %v881_v4 = vpack.c.bf16 %v853_v2, %v853_v2  ;;  %v1283_v6 = vsel %vm1265_vm0, %v1281_v0, %v1282_v63  ;;  %v967_v20 = vor.u32 %v966_v1, %v962_v8 }
 0x188   : > { %v2268_v9 = vpop.f32.mrf.mxu0 }
 0x189   : > { %v969_v10 = vshll.u32 %v881_v4, 16  ;;  %v1285_v11 = vrot.slane %v881_v4, 1  ;;  %v883_v13 = vpack.c.bf16 %v2268_v9, %v2268_v9  ;;  %v960_v14 = vsel %vm888_vm1, %v955_v5, %v959_v3 }
 0x18a   : > { %v856_v16 = vpop.f32.mrf.mxu0  ;;  %2282 = vmatmul.mubr.msk.bf16.gmra.mxu1 %vm1002_vm2, %v960_v14 }
 0x18b   : > { %v971_v18 = vrot.slane %v969_v10, 1  ;;  %v882_v19 = vpack.c.bf16 %v2267_v58, %v856_v16  ;;  %v1286_v21 = vsel %vm1265_vm0, %v1284_v17, %v1285_v11  ;;  %v981_v23 = vshll.u32 %v883_v13, 16  ;;  %v2879_v11 = vld [vmem:[%s3119_s4] sm:$0xff] }
 0x18c   : > { %v1288_v27 = vrot.slane %v883_v13, 1 }
 0x18d   : > { %v976_v24 = vshll.u32 %v882_v19, 16  ;;  %v972_v25 = vsel %vm888_vm1, %v967_v20, %v971_v18  ;;  %v1287_v28 = vrot.slane %v882_v19, 1  ;;  %v974_v29 = vshrl.u32 %v882_v19, 16  ;;  %v2884_v18 = vld [vmem:[%s3119_s4 + $0x8] sm:$0xff] }
 0x18e   : > { %2285 = vmatprep.mubr.msk.bf16.mxu1 %vm1002_vm2, %v972_v25  ;;  %v983_v36 = vrot.slane %v981_v23, 1 }
 0x18f   : > { %v978_v31 = vrot.slane %v976_v24, 1  ;;  %v1289_v35 = vsel %vm1265_vm0, %v1287_v28, %v1288_v27 }
 0x191   : > { %v979_v37 = vor.u32 %v978_v31, %v974_v29 }
 0x193   : > { %v984_v38 = vsel %vm888_vm1, %v979_v37, %v983_v36 }
 0x194   : > { %2286 = vmatmul.mubr.msk.bf16.gmra.mxu1 %vm1002_vm2, %v984_v38 }
 0x195   : > { %2293 = vmatprep.mubr.msk.bf16.mxu1 %vm1002_vm2, %v2731_v32  ;;  %v2433_v32 = vld [vmem:[%s3121_s6 + $0x18] sm:$0xff]  }
 0x196   : > { %2330 = vmatpush3.bf16.msra.mxu0 %v2433_v32 }
 0x197   : > { %2331 = vmatprep.subr.bf16.mxu0 %v2515_v22 }
 0x19c   : > { %2294 = vmatmul.mubr.msk.bf16.vlgmr.msra.gmra.mxu1 %vm1002_vm2, %v2739_v43  ;;  %v2434_v43 = vld [vmem:[%s3121_s6 + $0x10] sm:$0xff]  }
 0x19d   : > { %2310 = vmatpush3.bf16.msra.mxu1 %v2760_v7  ;;  %2297 = vmatprep.mubr.msk.bf16.mxu1 %vm1002_vm2, %v2743_v51 }
 0x19e   : > { %2311 = vmatprep.subr.bf16.mxu1 %v2432_v39  ;;  %2332 = vmatpush3.bf16.msra.mxu0 %v2434_v43 }
 0x19f   : > { %2333 = vmatprep.subr.bf16.mxu0 %v2515_v22 }
 0x1a1   : > { %2312 = vmatpush3.bf16.msra.mxu1 %v2432_v39 }
 0x1a2   : > { %2341 = vmatprep.subr.bf16.mxu1 %v2515_v22 }
 0x1a4   : > { %2298 = vmatmul.mubr.msk.bf16.gmra.mxu1 %vm1002_vm2, %v2764_v12  ;;  %v2436_v12 = vld [vmem:[%s3121_s6] sm:$0xff]  }
 0x1a5   : > { %2301 = vmatprep.mubr.msk.bf16.mxu1 %vm1002_vm2, %v2778_v33 }
 0x1ac   : > { %2302 = vmatmul.mubr.msk.bf16.gmra.mxu1 %vm1002_vm2, %v878_v46 }
 0x1ad   : > { %2305 = vmatprep.mubr.msk.bf16.mxu1 %vm1002_vm2, %v880_v50 }
 0x1b4   : > { %2306 = vmatmul.mubr.msk.bf16.gmra.mxu1 %vm1002_vm2, %v882_v19 }
 0x1b5   : > { %2313 = vmatprep.mubr.msk.bf16.mxu1 %vm1002_vm2, %v2737_v42 }
 0x1bc   : > { %2314 = vmatmul.mubr.msk.bf16.vlgmr.msra.gmra.mxu1 %vm1002_vm2, %v2750_v59  ;;  %v2435_v59 = vld [vmem:[%s3121_s6 + $0x8] sm:$0xff]  }
 0x1bd   : > { %2317 = vmatprep.mubr.msk.bf16.mxu1 %vm1002_vm2, %v2767_v15  ;;  %2334 = vmatpush3.bf16.msra.mxu0 %v2435_v59 }
 0x1be   : > { %2335 = vmatprep.subr.bf16.mxu0 %v2515_v22 }
 0x1c1   : > { %2336 = vmatpush3.bf16.msra.mxu0 %v2436_v12 }
 0x1c2   : > { %2361 = vmatprep.subr.bf16.mxu0 %v2515_v22 }
 0x1c4   : > { %2318 = vmatmul.mubr.msk.bf16.gmra.mxu1 %vm1002_vm2, %v2776_v26 }
 0x1c5   : > { %2321 = vmatprep.mubr.msk.bf16.mxu1 %vm1002_vm2, %v2786_v47 }
 0x1cc   : > { %2322 = vmatmul.mubr.msk.bf16.gmra.mxu1 %vm1002_vm2, %v1283_v6 }
 0x1cd   : > { %2325 = vmatprep.mubr.msk.bf16.mxu1 %vm1002_vm2, %v1286_v21 }
 0x1d4   : > { %2326 = vmatmul.mubr.msk.bf16.gmra.mxu1 %vm1002_vm2, %v1289_v35 }
 0x1d5   : > { %2357 = vmatprep.mubr.msk.bf16.mxu1 %vm2517_vm3, %v2515_v22 }
 0x22f   : > { %v2275_v42 = vpop.f32.mrf.mxu1 }
 0x231   : > { %v1061_v51 = vpop.f32.mrf.mxu1 }
 0x233   : > { %v2276_v7 = vpop.f32.mrf.mxu1 }
 0x235   : > { %v1064_v15 = vpop.f32.mrf.mxu1 }
 0x23c   : > { %v2279_v26 = vpop.f32.mrf.mxu1 }
 0x23e   : > { %v1077_v33 = vpop.f32.mrf.mxu1 }
 0x240   : > { %v2280_v40 = vpop.f32.mrf.mxu1 }
 0x242   : > { %v1080_v41 = vpop.f32.mrf.mxu1 }
 0x24a   : > { %v2850_v44 = vpop.f32.mrf.mxu1 }
 0x24c   : > { %v2852_v45 = vpop.f32.mrf.mxu1 }
 0x24e   : > { %v2854_v46 = vpop.f32.mrf.mxu1 }
 0x250   : > { %v2856_v47 = vpop.f32.mrf.mxu1 }
 0x254   : > { %v2858_v48 = vpop.f32.mrf.mxu1 }
 0x256   : > { %v2860_v49 = vpop.f32.mrf.mxu1 }
 0x258   : > { %v2862_v50 = vpop.f32.mrf.mxu1 }
 0x25a   : > { %v2864_v52 = vpop.f32.mrf.mxu1 }
 0x25c   : > { %v2295_v53 = vpop.f32.mrf.mxu1 }
 0x25d   : > { %v1195_v6 = vadd.f32 %v2295_v53, %v2275_v42 }
 0x25e   : > { %v1186_v54 = vpop.f32.mrf.mxu1 }
 0x25f   : > { %v1187_v9 = vadd.f32 %v1186_v54, %v1061_v51 }
 0x260   : > { %v2296_v55 = vpop.f32.mrf.mxu1 }
 0x261   : > { %v1198_v14 = vadd.f32 %v2296_v55, %v2276_v7 }
 0x262   : > { %v1189_v56 = vpop.f32.mrf.mxu1 }
 0x263   : > { %v1190_v19 = vadd.f32 %v1189_v56, %v1064_v15 }
 0x264   : > { %v2299_v57 = vpop.f32.mrf.mxu1 }
 0x265   : > { %v1211_v24 = vadd.f32 %v2299_v57, %v2279_v26 }
 0x266   : > { %v1202_v58 = vpop.f32.mrf.mxu1 }
 0x267   : > { %v1203_v29 = vadd.f32 %v1202_v58, %v1077_v33 }
 0x268   : > { %v2300_v60 = vpop.f32.mrf.mxu1 }
 0x269   : > { %v1214_v42 = vadd.f32 %v2300_v60, %v2280_v40 }
 0x26a   : > { %v1205_v61 = vpop.f32.mrf.mxu1 }
 0x26b   : > { %v1206_v26 = vadd.f32 %v1205_v61, %v1080_v41 }
 0x26c   : > { %v2303_v62 = vpop.f32.mrf.mxu1 }
 0x26d   : > { %v1227_v60 = vadd.f32 %v2303_v62, %v2850_v44 }
 0x26e   : > { %v1218_v63 = vpop.f32.mrf.mxu1 }
 0x270   : > { %v2304_v0 = vpop.f32.mrf.mxu1 }
 0x272   : > { %v2866_v1 = vpop.f32.mrf.mxu1 }
 0x274   : > { %v2868_v2 = vpop.f32.mrf.mxu1 }
 0x276   : > { %v2870_v3 = vpop.f32.mrf.mxu1 }
 0x278   : > { %v2872_v4 = vpop.f32.mrf.mxu1 }
 0x27a   : > { %v2874_v5 = vpop.f32.mrf.mxu1 }
 0x27c   : > { %v2315_v8 = vpop.f32.mrf.mxu1 }
 0x27d   : > { %v1430_v10 = vadd.f32 %v2315_v8, %v1195_v6 }
 0x27e   : > { %v1365_v13 = vpop.f32.mrf.mxu1 }
 0x27f   : > { %v1428_v16 = vadd.f32 %v1365_v13, %v1187_v9  ;;  %v1448_v20 = vadd.f32 %v2879_v11, %v1430_v10  ;;  %v1219_v13 = vadd.f32 %v1218_v63, %v2852_v45 }
 0x280   : > { %v2316_v17 = vpop.f32.mrf.mxu1 }
 0x281   : > { %v1431_v21 = vadd.f32 %v2316_v17, %v1198_v14  ;;  %v1446_v25 = vadd.f32 %v2879_v11, %v1428_v16  ;;  %v1472_v35 = vsel %vm1462_vm4, %v1448_v20, -inf }
 0x282   : > { %v1368_v23 = vpop.f32.mrf.mxu1 }
 0x283   : > { %v1449_v27 = vadd.f32 %v2884_v18, %v1431_v21  ;;  %v1429_v28 = vadd.f32 %v1368_v23, %v1190_v19  ;;  %v1463_v43 = vsel %vm1462_vm4, %v1446_v25, -inf  ;;  %v1230_v19 = vadd.f32 %v2304_v0, %v2854_v46 }
 0x284   : > { %v2319_v31 = vpop.f32.mrf.mxu1  ;;  %v1243_v46 = vadd.f32 %v2868_v2, %v2858_v48 }
 0x285   : > { %v1473_v36 = vsel %vm1462_vm4, %v1449_v27, -inf  ;;  %v1447_v37 = vadd.f32 %v2884_v18, %v1429_v28  ;;  %v1434_v38 = vadd.f32 %v2319_v31, %v1211_v24  ;;  %v1222_v28 = vadd.f32 %v2866_v1, %v2856_v47 }
 0x286   : > { %v1474_v39 = vmax.f32 %v1472_v35, %v1473_v36  ;;  %v1381_v32 = vpop.f32.mrf.mxu1  ;;  %v1235_v47 = vadd.f32 %v2870_v3, %v2860_v49  ;;  %v1246_v3 = vadd.f32 %v2872_v4, %v2862_v50 }
 0x287   : > { %v1464_v51 = vsel %vm1462_vm4, %v1447_v37, -inf  ;;  %v1432_v59 = vadd.f32 %v1381_v32, %v1203_v29  ;;  %v1452_v33 = vadd.f32 %v2879_v11, %v1434_v38 }
 0x288   : > { %v1475_v7 = vrot.slane %v1474_v39, 4  ;;  %v1465_v12 = vmax.f32 %v1463_v43, %v1464_v51  ;;  %v2320_v15 = vpop.f32.mrf.mxu1 }
 0x289   : > { %v1435_v53 = vadd.f32 %v2320_v15, %v1214_v42  ;;  %v1450_v57 = vadd.f32 %v2879_v11, %v1432_v59  ;;  %v1490_v10 = vsel %vm1462_vm4, %v1452_v33, -inf }
 0x28a   : > { %v1476_v54 = vmax.f32 %v1474_v39, %v1475_v7  ;;  %v1466_v55 = vrot.slane %v1465_v12, 4  ;;  %v1384_v56 = vpop.f32.mrf.mxu1 }
 0x28b   : > { %v1453_v58 = vadd.f32 %v2884_v18, %v1435_v53  ;;  %v1433_v40 = vadd.f32 %v1384_v56, %v1206_v26  ;;  %v1481_v21 = vsel %vm1462_vm4, %v1450_v57, -inf  ;;  %v2924_v57 = vld [vmem:[%s3120_s5] ss:$0 sm:$0xff] }
 0x28c   : > { %v1477_v6 = vrot.slane %v1476_v54, 2  ;;  %v1467_v8 = vmax.f32 %v1465_v12, %v1466_v55  ;;  %v2323_v9 = vpop.f32.mrf.mxu1 }
 0x28d   : > { %v1491_v41 = vsel %vm1462_vm4, %v1453_v58, -inf  ;;  %v1451_v61 = vadd.f32 %v2884_v18, %v1433_v40  ;;  %v1438_v16 = vadd.f32 %v2323_v9, %v1227_v60 }
 0x28e   : > { %v1492_v14 = vmax.f32 %v1490_v10, %v1491_v41  ;;  %v1397_v17 = vpop.f32.mrf.mxu1  ;;  %v1478_v20 = vmax.f32 %v1476_v54, %v1477_v6  ;;  %v1468_v62 = vrot.slane %v1467_v8, 2  ;;  %v1238_v10 = vadd.f32 %v2874_v5, %v2864_v52 }
 0x28f   : > { %v1482_v44 = vsel %vm1462_vm4, %v1451_v61, -inf  ;;  %v1436_v25 = vadd.f32 %v1397_v17, %v1219_v13  ;;  %v1456_v31 = vadd.f32 %v2879_v11, %v1438_v16 }
 0x290   : > { %v1493_v23 = vrot.slane %v1492_v14, 4  ;;  %v1483_v24 = vmax.f32 %v1481_v21, %v1482_v44  ;;  %v2324_v27 = vpop.f32.mrf.mxu1  ;;  %v1479_v0 = vrot.slane %v1478_v20, 1  ;;  %v1469_v38 = vmax.f32 %v1467_v8, %v1468_v62 }
 0x291   : > { %v1439_v29 = vadd.f32 %v2324_v27, %v1230_v19  ;;  %v1454_v42 = vadd.f32 %v2879_v11, %v1436_v25  ;;  %v1508_v48 = vsel %vm1462_vm4, %v1456_v31, -inf }
 0x292   : > { %v1494_v45 = vmax.f32 %v1492_v14, %v1493_v23  ;;  %v1484_v63 = vrot.slane %v1483_v24, 4  ;;  %v1400_v35 = vpop.f32.mrf.mxu1  ;;  %v1480_v15 = vmax.f32 %v1478_v20, %v1479_v0  ;;  %v1470_v53 = vrot.slane %v1469_v38, 1 }
 0x293   : > { %v1457_v36 = vadd.f32 %v2884_v18, %v1439_v29  ;;  %v1437_v37 = vadd.f32 %v1400_v35, %v1222_v28  ;;  %v1499_v55 = vsel %vm1462_vm4, %v1454_v42, -inf }
 0x294   : > { %v1495_v39 = vrot.slane %v1494_v45, 2  ;;  %v1485_v32 = vmax.f32 %v1483_v24, %v1484_v63  ;;  %v2327_v43 = vpop.f32.mrf.mxu1  ;;  %v1543_v50 = vadd.f32 %v2924_v57, %v1480_v15  ;;  %v1471_v4 = vmax.f32 %v1469_v38, %v1470_v53 }
 0x295   : > { %v1509_v1 = vsel %vm1462_vm4, %v1457_v36, -inf  ;;  %v1455_v51 = vadd.f32 %v2884_v18, %v1437_v37  ;;  %v1442_v2 = vadd.f32 %v2327_v43, %v1243_v46 }
 0x296   : > { %v1496_v59 = vmax.f32 %v1494_v45, %v1495_v39  ;;  %v1486_v7 = vrot.slane %v1485_v32, 2  ;;  %v1413_v12 = vpop.f32.mrf.mxu1  ;;  %v1510_v26 = vmax.f32 %v1508_v48, %v1509_v1  ;;  %v2936_v27 = vmax.f32 %v1543_v50, 0.0 }
 0x297   : > { %v1500_v33 = vsel %vm1462_vm4, %v1455_v51, -inf  ;;  %v1440_v56 = vadd.f32 %v1413_v12, %v1235_v47  ;;  %v1460_v8 = vadd.f32 %v2879_v11, %v1442_v2 }
 0x298   : > { %v1487_v54 = vmax.f32 %v1485_v32, %v1486_v7  ;;  %v2328_v49 = vpop.f32.mrf.mxu1  ;;  %v1511_v58 = vrot.slane %v1510_v26, 4  ;;  %v1501_v40 = vmax.f32 %v1499_v55, %v1500_v33  ;;  %v1497_v60 = vrot.slane %v1496_v59, 1 }
 0x299   : > { %v1443_v13 = vadd.f32 %v2328_v49, %v1246_v3  ;;  %v1458_v16 = vadd.f32 %v2879_v11, %v1440_v56  ;;  %v1526_v23 = vsel %vm1462_vm4, %v1460_v8, -inf  ;;  %v1542_v11 = vadd.f32 %v2924_v57, %v1471_v4 }
 0x29a   : > { %v1488_v6 = vrot.slane %v1487_v54, 1  ;;  %v1416_v9 = vpop.f32.mrf.mxu1  ;;  %v1512_v41 = vmax.f32 %v1510_v26, %v1511_v58  ;;  %v1502_v61 = vrot.slane %v1501_v40, 4  ;;  %v1498_v44 = vmax.f32 %v1496_v59, %v1497_v60 }
 0x29b   : > { %v1461_v20 = vadd.f32 %v2884_v18, %v1443_v13  ;;  %v1441_v21 = vadd.f32 %v1416_v9, %v1238_v10  ;;  %v1517_v63 = vsel %vm1462_vm4, %v1458_v16, -inf  ;;  %v1559_v32 = vpack.c.bf16 %v2936_v27, %v2936_v27 }
 0x29c   : > { %v1489_v14 = vmax.f32 %v1487_v54, %v1488_v6  ;;  %v1513_v17 = vrot.slane %v1512_v41, 2  ;;  %v1503_v19 = vmax.f32 %v1501_v40, %v1502_v61  ;;  %v1545_v36 = vadd.f32 %v2924_v57, %v1498_v44 }
 0x29d   : > { %v1527_v24 = vsel %vm1462_vm4, %v1461_v20, -inf  ;;  %v1459_v25 = vadd.f32 %v2884_v18, %v1441_v21  ;;  %v2946_v42 = vmax.f32 %v1542_v11, 0.0  ;;  %v1590_v15 = vunpack.c.l.b16 %v1559_v32 }
 0x29e   : > { %v1544_v62 = vadd.f32 %v2924_v57, %v1489_v14  ;;  %v1514_v52 = vmax.f32 %v1512_v41, %v1513_v17  ;;  %v1504_v5 = vrot.slane %v1503_v19, 2  ;;  %v1528_v28 = vmax.f32 %v1526_v23, %v1527_v24 }
 0x29f   : > { %v1518_v31 = vsel %vm1462_vm4, %v1459_v25, -inf  ;;  %v2950_v59 = vmax.f32 %v1545_v36, 0.0  ;;  %v1558_v26 = vpack.c.bf16 %v2946_v42, %v2946_v42  ;;  %v1597_v60 = vrot.slane %v1590_v15, 7 }
 0x2a0   : > { %v1515_v29 = vrot.slane %v1514_v52, 1  ;;  %v1505_v45 = vmax.f32 %v1503_v19, %v1504_v5  ;;  %v2941_v35 = vmax.f32 %v1544_v62, 0.0  ;;  %v1529_v46 = vrot.slane %v1528_v28, 4 }
 0x2a1   : > { %v1519_v0 = vmax.f32 %v1517_v63, %v1518_v31  ;;  %v1561_v56 = vpack.c.bf16 %v2950_v59, %v2950_v59  ;;  %v1589_v6 = vunpack.c.l.b16 %v1558_v26  ;;  %v2518_v31 = vmov 0  }
 0x2a2   : > { %v1516_v37 = vmax.f32 %v1514_v52, %v1515_v29  ;;  %v1506_v38 = vrot.slane %v1505_v45, 1  ;;  %v1530_v18 = vmax.f32 %v1528_v28, %v1529_v46  ;;  %v1560_v47 = vpack.c.bf16 %v2941_v35, %v2941_v35  ;;  %2417 = vset.pattern.permute.xlu1 %v2518_v31  ;;  %v1748_v46 = vld [vmem:[%s398_s25] sm:$0xff]  ;;  %2418 = vset.pattern.permute.xlu0 %v2518_v31  ;;  %s2034_s25 = sshll.u32 %s388_s24, 3 }
 0x2a3   : > { %v1520_v39 = vrot.slane %v1519_v0, 4  ;;  %v1592_v61 = vunpack.c.l.b16 %v1561_v56  ;;  %v1599_v14 = vsel %vm1598_vm5, %v1597_v60, %v1589_v6  ;;  %1750 = vperm.xlu1 %2417, %v1748_v46   ;;  %v2143_v46 = vld [vmem:[%s3125_s10] ss:$0 sm:$0xff] }
 0x2a4   : > { %v1507_v43 = vmax.f32 %v1505_v45, %v1506_v38  ;;  %v1531_v1 = vrot.slane %v1530_v18, 2  ;;  %v1547_v7 = vadd.f32 %v2924_v57, %v1516_v37  ;;  %v1591_v53 = vunpack.c.l.b16 %v1560_v47 }
 0x2a5   : > { %v1521_v51 = vmax.f32 %v1519_v0, %v1520_v39  ;;  %v1603_v21 = vrot.slane %v1592_v61, 5  ;;  %v2120_v0 = vld [vmem:[%s3122_s7] ss:$0 sm:$0xff] }
 0x2a6   : > { %v1546_v48 = vadd.f32 %v2924_v57, %v1507_v43  ;;  %v1532_v2 = vmax.f32 %v1530_v18, %v1531_v1  ;;  %v2960_v49 = vmax.f32 %v1547_v7, 0.0  ;;  %v1600_v8 = vrot.slane %v1591_v53, 6  ;;  %v2437_v53 = vld [vmem:[%s3124_s9 + $0x38] sm:$0xff]  }
 0x2a7   : > { %v1522_v12 = vrot.slane %v1521_v51, 2  ;;  %2342 = vmatpush3.bf16.msra.mxu1 %v2437_v53 }
 0x2a8   : > { %v2956_v33 = vmax.f32 %v1546_v48, 0.0  ;;  %v1533_v54 = vrot.slane %v1532_v2, 1  ;;  %v1563_v13 = vpack.c.bf16 %v2960_v49, %v2960_v49  ;;  %v1602_v16 = vsel %vm1601_vm6, %v1600_v8, %v1599_v14  ;;  %2343 = vmatprep.subr.bf16.mxu1 %v2515_v22 }
 0x2a9   : > { %v1523_v55 = vmax.f32 %v1521_v51, %v1522_v12  ;;  %v1605_v23 = vsel %vm1604_vm7, %v1603_v21, %v1602_v16  ;;  %v2444_v21 = vld [vmem:[%s3124_s9 + $0x8] sm:$0xff]  }
 0x2aa   : > { %v1562_v3 = vpack.c.bf16 %v2956_v33, %v2956_v33  ;;  %v1534_v58 = vmax.f32 %v1532_v2, %v1533_v54  ;;  %v1594_v44 = vunpack.c.l.b16 %v1563_v13 }
 0x2ab   : > { %v1524_v40 = vrot.slane %v1523_v55, 1 }
 0x2ac   : > { %v1593_v9 = vunpack.c.l.b16 %v1562_v3  ;;  %v1549_v10 = vadd.f32 %v2924_v57, %v1534_v58 }
 0x2ad   : > { %v1525_v41 = vmax.f32 %v1523_v55, %v1524_v40 }
 0x2ae   : > { %v1557_v50 = vmax.f32 %v1549_v10, 0.0  ;;  %v1606_v17 = vrot.slane %v1593_v9, 4  ;;  %v2439_v10 = vld [vmem:[%s3124_s9 + $0x28] sm:$0xff]  }
 0x2af   : > { %v1548_v4 = vadd.f32 %v2924_v57, %v1525_v41  ;;  %v1609_v57 = vrot.slane %v1594_v44, 3 }
 0x2b0   : > { %v1565_v19 = vpack.c.bf16 %v1557_v50, %v1557_v50  ;;  %v1608_v5 = vsel %vm1607_vm8, %v1606_v17, %v1605_v23  ;;  %v2440_v17 = vld [vmem:[%s3124_s9 + $0x20] sm:$0xff]  }
 0x2b1   : > { %v1556_v20 = vmax.f32 %v1548_v4, 0.0  ;;  %v1611_v28 = vsel %vm1610_vm9, %v1609_v57, %v1608_v5  ;;  %v2447_v4 = vld [vmem:[%s3123_s8 + $0x8] sm:$0xff]  }
 0x2b2   : > { %v1596_v52 = vunpack.c.l.b16 %v1565_v19  ;;  %v2441_v19 = vld [vmem:[%s3124_s9 + $0x18] sm:$0xff]  }
 0x2b3   : > { %v1564_v62 = vpack.c.bf16 %v1556_v20, %v1556_v20 }
 0x2b4   : > { %v1615_v11 = vrot.slane %v1596_v52, 1 }
 0x2b5   : > { %v1595_v24 = vunpack.c.l.b16 %v1564_v62  ;;  %v2446_v62 = vld [vmem:[%s3124_s9] sm:$0xff]  }
 0x2b7   : > { %v1612_v25 = vrot.slane %v1595_v24, 2  ;;  %v2448_v24 = vld [vmem:[%s3123_s8] sm:$0xff]  }
 0x2b9   : > { %v1614_v29 = vsel %vm1613_vm10, %v1612_v25, %v1611_v28 }
 0x2ba   : > { %v1617_v45 = vsel %vm1616_vm11, %v1615_v11, %v1614_v29 }
 0x2bb   : > { %v1618_v63 = vpack.c.b16 %v1617_v45, %v1617_v45 }
 0x2bd   : > { %2338 = vmatmul.mubr.msk.bf16.vlgmr.msra.gmra.mxu0 %vm1462_vm4, %v1618_v63 }
 0x2be   : > { %2369 = vmatprep.mubr.msk.bf16.mxu0 %vm2517_vm3, %v2515_v22 }
 0x31e   : > { %v1751_v44 = vpop.permute.xlu1 %1750 }
 0x31f   : > { %vm1752_vm12 = vcmp.eq.s32.totalorder %v1751_v44, %v2676_v30 }
 0x320   : > { %vm2136_vm13 = vmpackc.low %vm1752_vm12, %vm1752_vm12 }
 0x37d   : > { %v1680_v36 = vpop.f32.mrf.mxu0 }
 0x37e   : > { %v2986_v37 = vadd.f32 %v2120_v0, %v1680_v36 }
 0x37f   : > { %v2339_v38 = vpop.f32.mrf.mxu0 }
 0x380   : > { %v2989_v18 = vmax.f32 %v2986_v37, 0.0  ;;  %v2126_v23 = vmul.f32 -1.442695, %v2986_v37 }
 0x381   : > { %v1683_v39 = vpop.f32.mrf.mxu0 }
 0x382   : > { %v1694_v32 = vrot.slane %v2989_v18, 1  ;;  %v1695_v43 = vrot.slane %v2989_v18, 2  ;;  %v1696_v47 = vrot.slane %v2989_v18, 3  ;;  %v1697_v51 = vrot.slane %v2989_v18, 4 }
 0x383   : > { %v2340_v1 = vpop.f32.mrf.mxu0  ;;  %v1698_v7 = vrot.slane %v2989_v18, 5  ;;  %v1699_v48 = vrot.slane %v2989_v18, 6  ;;  %v1700_v2 = vrot.slane %v2989_v18, 7  ;;  %v1709_v55 = vsub.f32 %v2946_v42, %v2989_v18 }
 0x384   : > { %v1710_v12 = vsub.f32 %v2936_v27, %v1694_v32  ;;  %v1711_v15 = vsub.f32 %v2941_v35, %v1695_v43  ;;  %v1712_v26 = vsub.f32 %v2950_v59, %v1696_v47  ;;  %v1713_v54 = vsub.f32 %v2956_v33, %v1697_v51  ;;  %v2438_v27 = vld [vmem:[%s3124_s9 + $0x30] sm:$0xff]   ;;  %v2443_v35 = vld [vmem:[%s3123_s8 + $0x18] sm:$0xff]  }
 0x385   : > { %v1714_v56 = vsub.f32 %v2960_v49, %v1698_v7  ;;  %v1715_v59 = vsub.f32 %v1556_v20, %v1699_v48  ;;  %v1716_v33 = vsub.f32 %v1557_v50, %v1700_v2  ;;  %2362 = vmatpush3.bf16.msra.mxu0 %v2443_v35  ;;  %v2445_v49 = vld [vmem:[%s3123_s8 + $0x10] sm:$0xff]   ;;  %2344 = vmatpush3.bf16.msra.mxu1 %v2438_v27  ;;  %2449 = vpow2.f32 %v2126_v23 }
 0x386   : > { %v1725_v3 = vrot.slane %v1710_v12, 7  ;;  %v1727_v58 = vrot.slane %v1711_v15, 6  ;;  %v1729_v42 = vrot.slane %v1712_v26, 5  ;;  %v1731_v6 = vrot.slane %v1713_v54, 4  ;;  %2363 = vmatprep.subr.bf16.mxu0 %v2515_v22  ;;  %2345 = vmatprep.subr.bf16.mxu1 %v2515_v22  ;;  %v2442_v20 = vld [vmem:[%s3124_s9 + $0x10] sm:$0xff]  }
 0x387   : > { %v1733_v9 = vrot.slane %v1714_v56, 3  ;;  %v1735_v61 = vrot.slane %v1715_v59, 2  ;;  %v1737_v50 = vrot.slane %v1716_v33, 1 }
 0x388   : > { %v1726_v40 = vsel %vm1598_vm5, %v1725_v3, %v1709_v55 }
 0x389   : > { %v1728_v60 = vsel %vm1601_vm6, %v1727_v58, %v1726_v40  ;;  %2364 = vmatpush3.bf16.msra.mxu0 %v2445_v49  ;;  %2346 = vmatpush3.bf16.msra.mxu1 %v2439_v10 }
 0x38a   : > { %v1730_v8 = vsel %vm1604_vm7, %v1729_v42, %v1728_v60  ;;  %2365 = vmatprep.subr.bf16.mxu0 %v2515_v22  ;;  %2347 = vmatprep.subr.bf16.mxu1 %v2515_v22 }
 0x38b   : > { %v1732_v41 = vsel %vm1607_vm8, %v1731_v6, %v1730_v8 }
 0x38c   : > { %v1734_v13 = vsel %vm1610_vm9, %v1733_v9, %v1732_v41 }
 0x38d   : > { %v1736_v14 = vsel %vm1613_vm10, %v1735_v61, %v1734_v13  ;;  %2366 = vmatpush3.bf16.msra.mxu0 %v2447_v4  ;;  %2348 = vmatpush3.bf16.msra.mxu1 %v2440_v17 }
 0x38e   : > { %v1738_v16 = vsel %vm1616_vm11, %v1737_v50, %v1736_v14  ;;  %2367 = vmatprep.subr.bf16.mxu0 %v2515_v22  ;;  %2349 = vmatprep.subr.bf16.mxu1 %v2515_v22 }
 0x38f   : > { %1739 = vrot.lane.b32.xlu0 %v1738_v16, %s2519_s16 }
 0x391   : > { %2350 = vmatpush3.bf16.msra.mxu1 %v2441_v19  ;;  %2368 = vmatpush3.bf16.msra.mxu0 %v2448_v24 }
 0x392   : > { %2351 = vmatprep.subr.bf16.mxu1 %v2515_v22  ;;  %v2450_v52 = vpop.eup %2449 }
 0x393   : > { %v1690_v5 = vadd.f32 1.0, %v2450_v52 }
 0x395   : > { %2352 = vmatpush3.bf16.msra.mxu1 %v2442_v20  ;;  %2451 = vrcp.f32 %v1690_v5 }
 0x396   : > { %2353 = vmatprep.subr.bf16.mxu1 %v2515_v22 }
 0x399   : > { %2354 = vmatpush3.bf16.msra.mxu1 %v2444_v21 }
 0x39a   : > { %2355 = vmatprep.subr.bf16.mxu1 %v2515_v22 }
 0x39d   : > { %2356 = vmatpush3.bf16.msra.mxu1 %v2446_v62 }
 0x3a0   : > { %2358 = vmatmul.mubr.msk.bf16.vlgmr.msra.gmra.mxu1 %vm2136_vm13, %v2516_v34 }
 0x3a2   : > { %v2452_v57 = vpop.eup %2451 }
 0x401   : > { %v1740_v22 = vpop.permute.xlu0 %1739 }
 0x402   : > { %v1742_v30 = vmul.f32 %v2452_v57, %v1740_v22 }
 0x404   : > { %1744 = vrot.lane.b32.xlu0 %v1742_v30, %s2519_s16  ;;  %s390_s16 = scalar_lea.vmem [#allocation2], %s2034_s25 }
 0x405   : > { %s1959_s15 = sshll.u32 %s390_s16, 4  ;;  %s3075_s15 = int_to_ptr.vmem [resolvable:$true] %s1959_s15 }
 0x406   : > { %s2453_s25 = scalar_lea.vmem %s3075_s15, 128  ;;  %p2460_p0 = scmp.lt.s32.totalorder %s3075_s15, %s2458_s30 }
 0x407   : > { %p2454_p11 = scmp.ne.s32.totalorder %s3075_s15, %s2453_s25  ;;  %p2461_p1 = scmp.lt.s32.totalorder %s2459_s14, %s2453_s25 }
 0x409   : > { %p2455_p12 = pnand %p2454_p11, %p2619_p5  ;;  %p2462_p2 = por %p2461_p1, %p2460_p0 }
 0x40b   : > { %p2456_p13 = pneg %p2455_p12 }
 0x40d   : > { %p2463_p3 = pnand %p2462_p2, %p2456_p13 }
 0x460   : > { %v1863_v25 = vpop.f32.mrf.mxu1 }
 0x462   : > { %v2359_v34 = vpop.f32.mrf.mxu1 }
 0x464   : > { %v1866_v11 = vpop.f32.mrf.mxu1 }
 0x466   : > { %v2360_v28 = vpop.f32.mrf.mxu1 }
 0x476   : > { %v1745_v29 = vpop.permute.xlu0 %1744 }
 0x477   : > { %v1747_v45 = vadd.f32 %v1745_v29, %v2989_v18 }
 0x479   : > { %v1756_v63 = vpack.c.bf16 %v1747_v45, %v1747_v45 }
 0x47b   : > { %2370 = vmatmul.mubr.msk.bf16.vlgmr.msra.gmra.mxu0 %vm1462_vm4, %v1756_v63 }
 0x53b   : > { %v1930_v31 = vpop.f32.mrf.mxu0 }
 0x53c   : > { %v1931_v0 = vadd.f32 %v1930_v31, %v1863_v25 }
 0x53d   : > { %v2371_v36 = vpop.f32.mrf.mxu0 }
 0x53e   : > { %v1943_v37 = vadd.f32 %v2143_v46, %v1931_v0 }
 0x53f   : > { %v1933_v38 = vpop.f32.mrf.mxu0 }
 0x540   : > { %1944 = vst.msk [vmem:[%s390_s16] sm:$0xff] %vm1002_vm2, %v1943_v37 }
 0x541   : > { %v2372_v18 = vpop.f32.mrf.mxu0 }
 0x542   : > { %2466 = shalt.err (!%p2463_p3)
}
 0x543   : > { %s2467_s16 = scalar_lea.hbm %s3073_s22, 128  ;;  %s2471_s13 = scalar_lea.hbm %s3126_s11, 256 }
 0x544   : > { %p2468_p4 = scmp.ne.s32.totalorder %s3073_s22, %s2467_s16  ;;  %p2472_p9 = scmp.lt.s32.totalorder %s3073_s22, %s3126_s11 }
 0x545   : > { %p2473_p10 = scmp.lt.s32.totalorder %s2471_s13, %s2467_s16 }
 0x546   : > { %p2469_p7 = pnand %p2468_p4, %p2619_p5 }
 0x547   : > { %p2474_p11 = por %p2473_p10, %p2472_p9 }
 0x548   : > { %p2470_p8 = pneg %p2469_p7 }
 0x54a   : > { %p2475_p12 = pnand %p2474_p11, %p2470_p8 }
 0x54c   : > { %2478 = shalt.err (!%p2475_p12)
}
 0x54d   : > { %2373 = dma.vmem_to_hbm [thread:$0]  (%p2619_p5), %s3075_s15, 128, %s3073_s22, %s1946_s21  }
 0x54e PF: > { %p2379_p13 = scmp.ge.s32.totalorder %s2513_s20, 2  ;;  %s1971_s25 = sand.u32 1, %s2501_s17  }
 0x54f   : > { %s1972_s0 = scalar_lea.sflag [#allocation3], %s1971_s25 }
 0x550   : > { %p2376_p0 = pnand %p2379_p13, %p2623_p6 }
 0x552   : > { %p2377_p1 = pneg %p2376_p0 }
 0x554   : > { %2496 = dma.done.wait (%p2377_p1), %s1972_s0, 128  }
 0x555   : > { %2498 = vsyncadd (%p2377_p1), %s1972_s0, 4294967168  ;;  %p21_p2 = scmp.ge.s32.totalorder %s2606_s23, 4   ;;  %s3131_s17 = smov %s2505_s18 }
 0x556   : > { %s3132_s18 = smov %s2509_s19  ;;  %s3133_s19 = smov %s2617_s26 }
 0x557   : > { %s3134_s20 = smov %s2606_s23  ;;  %23 = sbr.rel (!%p21_p2) target bundleno = 5 (0x5), region = 104 }
 0x55c   :  { %1977 = vsyncpa [#allocation3], 1 }
 0x55d   :  { %1979 = vsyncpa [#allocation3 + $0x1], 1 }

</bundles_post_ra>
